<compile_context>
chip_gen: v6e
topology: v6e:2x2x1
jax: 0.10.0
libtpu: 0.0.40
codegen_flags: <defaults>
</compile_context>

<pallas_src>
import functools

import jax
import jax.numpy as jnp
import numpy as np
from jax.experimental import pallas as pl
from jax.experimental.pallas import tpu as pltpu


def _many_body_voxel_kernel(dv_ref, w_ref, offc_ref, offyz_ref, o_ref, *,
                            coeffs, n_types, grid_size):
    """Block of TA atoms: separable gaussian smearing + neighbor reduction.

    dv_ref   : (TA, N, 3)     distance vectors
    w_ref    : (TA, C, N)     per-channel neighbor weights (cutoff * type gate)
    offc_ref : (L, G, 1)      grid offsets as a column (sublane layout)
    offyz_ref: (L, 2, G*G)    grid offsets broadcast over the flattened (y,z) plane
    o_ref    : (TA, C*G, G*G) output voxel slab; row = c*G + i, col = j*G + k
    """
    G = grid_size
    Z = n_types
    dv = dv_ref[...]                          # (TA, N, 3)
    w = w_ref[...]                            # (TA, C, N)
    TA, N, _ = dv.shape

    dvx = dv[:, :, 0][:, None, :]             # (TA, 1, N)  N on lanes
    dvy = dv[:, :, 1:2]                       # (TA, N, 1)  layout-preserving slice
    dvz = dv[:, :, 2:3]                       # (TA, N, 1)

    for l, coeff in enumerate(coeffs):        # static unroll over grid lengths
        offc = offc_ref[l][None]              # (1, G, 1)
        oyz = offyz_ref[l]                    # (2, G*G)
        offy = oyz[0:1, :][None]              # (1, 1, G*G)
        offz = oyz[1:2, :][None]              # (1, 1, G*G)

        # separable x-gaussian, laid out (TA, G, N) for the contraction below
        ex_t = jnp.exp(coeff * (offc - dvx) ** 2)
        # fused y/z gaussian over the flattened G*G plane -> (TA, N, G*G)
        dy = offy - dvy
        dz = offz - dvz
        eyz = jnp.exp(coeff * (dy * dy + dz * dz))

        # weighted x-factor per atom-type channel: (TA, Z*G, N)
        wl = w[:, l * Z:(l + 1) * Z, :]                         # (TA, Z, N)
        wx = (wl[:, :, None, :] * ex_t[:, None, :, :]).reshape(TA, Z * G, N)

        # neighbor reduction on the MXU: (Z*G, N) x (N, G*G) per atom
        res = jnp.einsum('azn,ang->azg', wx, eyz,
                         preferred_element_type=jnp.float32)    # (TA, Z*G, G*G)

        # sublane-aligned (32-row) / lane-dense (256-wide) slab store
        o_ref[:, l * Z * G:(l + 1) * Z * G, :] = res


def many_body_voxel(distance_vector, distances, atomic_numbers, neighbors,
                    neighbor_mask, *, atom_types=(1, 8), grid_length=(6.0, 10.0),
                    grid_size=16, atoms_per_block=8):
    B, A, N, _ = distance_vector.shape
    G = int(grid_size)
    G2 = G * G
    L = len(grid_length)
    Z = len(atom_types)
    C = L * Z

    dv = distance_vector.astype(jnp.float32)
    d = distances.astype(jnp.float32)
    nmask = neighbor_mask.astype(jnp.float32)

    # ---- glue: per-neighbor / per-channel weights = CosineCutoff(d) * (ZN == z)
    ZN = atomic_numbers[jnp.arange(B)[:, None, None], neighbors]     # (B, A, N)
    ZN = ZN.astype(jnp.float32) * nmask
    w_list = []
    for l in grid_length:
        cut = 0.5 * float(l)                                         # CosineCutoff(0.5*l)
        Ccut = 0.5 * (jnp.cos(d * np.pi / cut) + 1.0)
        Ccut = Ccut * (d < cut).astype(jnp.float32)
        for z in atom_types:
            w_list.append(Ccut * (ZN == float(z)).astype(jnp.float32))
    w = jnp.stack(w_list, axis=2)                                    # (B, A, C, N)

    # ---- glue: 1-D grid offsets and gaussian coefficient per grid length
    offc_list, offyz_list, coeffs = [], [], []
    for l in grid_length:
        offs = jnp.linspace(-0.5 * float(l), 0.5 * float(l), G).astype(jnp.float32)
        offc_list.append(offs[:, None])                              # (G, 1)
        offyz_list.append(jnp.stack([jnp.repeat(offs, G),            # y offset at col j*G+k
                                     jnp.tile(offs, G)], axis=0))    # z offset at col j*G+k
        delta = float(l) / (G - 1)                                   # sigma
        coeffs.append(float(-0.5 / delta ** 2))
    offc = jnp.stack(offc_list, axis=0)                              # (L, G, 1)
    offyz = jnp.stack(offyz_list, axis=0)                            # (L, 2, G2)

    # ---- flatten (B, A) and pad to a multiple of the per-step atom block
    BA = B * A
    TA = max(1, min(int(atoms_per_block), BA))
    n_blk = pl.cdiv(BA, TA)
    BAp = n_blk * TA
    dv_f = dv.reshape(BA, N, 3)
    w_f = w.reshape(BA, C, N)
    if BAp != BA:
        dv_f = jnp.pad(dv_f, ((0, BAp - BA), (0, 0), (0, 0)))
        w_f = jnp.pad(w_f, ((0, BAp - BA), (0, 0), (0, 0)))

    kernel = functools.partial(_many_body_voxel_kernel,
                               coeffs=tuple(coeffs), n_types=Z, grid_size=G)

    out = pl.pallas_call(
        kernel,
        out_shape=jax.ShapeDtypeStruct((BAp, C * G, G2), jnp.float32),
        grid=(n_blk,),
        in_specs=[
            pl.BlockSpec((TA, N, 3), lambda t: (t, 0, 0)),
            pl.BlockSpec((TA, C, N), lambda t: (t, 0, 0)),
            pl.BlockSpec((L, G, 1), lambda t: (0, 0, 0)),
            pl.BlockSpec((L, 2, G2), lambda t: (0, 0, 0)),
        ],
        out_specs=pl.BlockSpec((TA, C * G, G2), lambda t: (t, 0, 0)),
        compiler_params=pltpu.CompilerParams(
            dimension_semantics=("parallel",),
            vmem_limit_bytes=32 * 1024 * 1024),
    )(dv_f, w_f, offc, offyz)

    # (BAp, C*G, G2) rows are (c*G+i), cols (j*G+k)  ->  free row-major reshape
    return out[:BA].reshape(B, A, C, G, G, G)


def _reference(dv, d, atomic_numbers, neighbors, neighbor_mask,
               atom_types, grid_length, G):
    """Pure-JAX transcription of the PyTorch forward, for verification."""
    B, A, N, _ = dv.shape
    ZN = atomic_numbers[jnp.arange(B)[:, None, None], neighbors]
    ZN = ZN.astype(jnp.float32) * neighbor_mask
    outs = []
    for l in grid_length:
        offs = jnp.linspace(-0.5 * l, 0.5 * l, G)
        gx, gy, gz = jnp.meshgrid(offs, offs, offs, indexing="ij")
        grid = jnp.stack([gx, gy, gz], axis=-1)                      # (G,G,G,3)
        diff = grid[None, None, None] - dv[:, :, :, None, None, None, :]
        diff2 = jnp.sum(diff ** 2, axis=-1)                          # (B,A,N,G,G,G)
        delta = l / (G - 1)
        box = jnp.exp((-0.5 / delta ** 2) * diff2)
        cut = 0.5 * l
        Ccut = 0.5 * (jnp.cos(d * np.pi / cut) + 1.0)
        Ccut = Ccut * (d < cut).astype(jnp.float32)
        box = box * Ccut[:, :, :, None, None, None]
        for z in atom_types:
            m = (ZN == z).astype(jnp.float32)
            outs.append(jnp.sum(box * m[:, :, :, None, None, None], axis=2))
    return jnp.stack(outs, axis=2)


if __name__ == "__main__":
    B, A, N, G = 2, 4, 8, 16
    atom_types = (1, 8)
    grid_length = (6.0, 10.0)

    key = jax.random.PRNGKey(0)
    k1, k2, k3, k4 = jax.random.split(key, 4)
    distance_vector = jax.random.normal(k1, (B, A, N, 3), jnp.float32) * 2.0
    distances = jnp.linalg.norm(distance_vector, axis=-1)
    atomic_numbers = jax.random.choice(k2, jnp.array([1, 8], jnp.int32), (B, A))
    neighbors = jax.random.randint(k3, (B, A, N), 0, A, jnp.int32)
    neighbor_mask = (jax.random.uniform(k4, (B, A, N)) > 0.2).astype(jnp.float32)

    out = many_body_voxel(distance_vector, distances, atomic_numbers, neighbors,
                          neighbor_mask, atom_types=atom_types,
                          grid_length=grid_length, grid_size=G)
    out = jax.block_until_ready(out)

    assert out.shape == (B, A, len(grid_length) * len(atom_types), G, G, G)

    ref = _reference(distance_vector, distances, atomic_numbers, neighbors,
                     neighbor_mask, atom_types, grid_length, G)
    if not np.allclose(np.asarray(out), np.asarray(ref), rtol=2e-3, atol=2e-3):
        raise SystemExit("MISMATCH vs reference")

    # TODO(synk): modes 'embed_elemental'/'split_elemental', polar smearing,
    # polynomial cutoff and return_atombox=True are not implemented.
    print("KERNEL_OK")
</pallas_src>

<mosaic_0001>
module attributes {stable_mosaic.version = 11 : i64} {
  func.func @_many_body_voxel_kernel(%arg0: i32, %arg1: memref<8x8x3xf32, #tpu.memory_space<vmem>>, %arg2: memref<8x4x8xf32, #tpu.memory_space<vmem>>, %arg3: memref<2x16x1xf32, #tpu.memory_space<vmem>>, %arg4: memref<2x2x256xf32, #tpu.memory_space<vmem>>, %arg5: memref<8x64x256xf32, #tpu.memory_space<vmem>>) attributes {dimension_semantics = [#tpu.dimension_semantics<parallel>], iteration_bounds = array<i64: 1>, scalar_prefetch = 0 : i64, scratch_operands = 0 : i64, tpu.core_type = #tpu.core_type<tc>, window_params = [{transform_indices = @transform_0, window_bounds = array<i64: 8, 8, 3>}, {transform_indices = @transform_1, window_bounds = array<i64: 8, 4, 8>}, {pipeline_mode = #tpu.pipeline_mode<synchronous>, transform_indices = @transform_2, window_bounds = array<i64: 2, 16, 1>}, {pipeline_mode = #tpu.pipeline_mode<synchronous>, transform_indices = @transform_3, window_bounds = array<i64: 2, 2, 256>}, {transform_indices = @transform_4, window_bounds = array<i64: 8, 64, 256>}]} {
    %c0 = arith.constant 0 : index
    %c0_0 = arith.constant 0 : index
    %c0_1 = arith.constant 0 : index
    %0 = vector.load %arg1[%c0, %c0_0, %c0_1] : memref<8x8x3xf32, #tpu.memory_space<vmem>>, vector<8x8x3xf32>
    %c0_2 = arith.constant 0 : index
    %c0_3 = arith.constant 0 : index
    %c0_4 = arith.constant 0 : index
    %1 = vector.load %arg2[%c0_2, %c0_3, %c0_4] : memref<8x4x8xf32, #tpu.memory_space<vmem>>, vector<8x4x8xf32>
    %2 = vector.extract_strided_slice %0 {offsets = [0, 0, 0], sizes = [8, 8, 1], strides = [1, 1, 1]} : vector<8x8x3xf32> to vector<8x8x1xf32>
    %3 = vector.shape_cast %2 : vector<8x8x1xf32> to vector<8x8xf32>
    %4 = vector.shape_cast %3 : vector<8x8xf32> to vector<8x1x8xf32>
    %5 = vector.extract_strided_slice %0 {offsets = [0, 0, 1], sizes = [8, 8, 1], strides = [1, 1, 1]} : vector<8x8x3xf32> to vector<8x8x1xf32>
    %6 = vector.extract_strided_slice %0 {offsets = [0, 0, 2], sizes = [8, 8, 1], strides = [1, 1, 1]} : vector<8x8x3xf32> to vector<8x8x1xf32>
    %c0_5 = arith.constant 0 : index
    %c0_6 = arith.constant 0 : index
    %c0_7 = arith.constant 0 : index
    %7 = vector.load %arg3[%c0_5, %c0_6, %c0_7] : memref<2x16x1xf32, #tpu.memory_space<vmem>>, vector<1x16x1xf32>
    %8 = vector.shape_cast %7 : vector<1x16x1xf32> to vector<16x1xf32>
    %9 = vector.shape_cast %8 : vector<16x1xf32> to vector<1x16x1xf32>
    %c0_8 = arith.constant 0 : index
    %c0_9 = arith.constant 0 : index
    %c0_10 = arith.constant 0 : index
    %10 = vector.load %arg4[%c0_8, %c0_9, %c0_10] : memref<2x2x256xf32, #tpu.memory_space<vmem>>, vector<1x2x256xf32>
    %11 = vector.shape_cast %10 : vector<1x2x256xf32> to vector<2x256xf32>
    %12 = vector.extract_strided_slice %11 {offsets = [0, 0], sizes = [1, 256], strides = [1, 1]} : vector<2x256xf32> to vector<1x256xf32>
    %13 = vector.shape_cast %12 : vector<1x256xf32> to vector<1x1x256xf32>
    %14 = vector.extract_strided_slice %11 {offsets = [1, 0], sizes = [1, 256], strides = [1, 1]} : vector<2x256xf32> to vector<1x256xf32>
    %15 = vector.shape_cast %14 : vector<1x256xf32> to vector<1x1x256xf32>
    %16 = vector.broadcast %9 : vector<1x16x1xf32> to vector<8x16x8xf32>
    %17 = vector.broadcast %4 : vector<8x1x8xf32> to vector<8x16x8xf32>
    %18 = arith.subf %16, %17 : vector<8x16x8xf32>
    %19 = arith.mulf %18, %18 : vector<8x16x8xf32>
    %cst = arith.constant -3.125000e+00 : f32
    %20 = vector.broadcast %cst : f32 to vector<8x16x8xf32>
    %21 = arith.mulf %20, %19 : vector<8x16x8xf32>
    %22 = math.exp %21 : vector<8x16x8xf32>
    %23 = vector.broadcast %13 : vector<1x1x256xf32> to vector<8x8x256xf32>
    %24 = vector.broadcast %5 : vector<8x8x1xf32> to vector<8x8x256xf32>
    %25 = arith.subf %23, %24 : vector<8x8x256xf32>
    %26 = vector.broadcast %15 : vector<1x1x256xf32> to vector<8x8x256xf32>
    %27 = vector.broadcast %6 : vector<8x8x1xf32> to vector<8x8x256xf32>
    %28 = arith.subf %26, %27 : vector<8x8x256xf32>
    %29 = arith.mulf %25, %25 : vector<8x8x256xf32>
    %30 = arith.mulf %28, %28 : vector<8x8x256xf32>
    %31 = arith.addf %29, %30 : vector<8x8x256xf32>
    %cst_11 = arith.constant -3.125000e+00 : f32
    %32 = vector.broadcast %cst_11 : f32 to vector<8x8x256xf32>
    %33 = arith.mulf %32, %31 : vector<8x8x256xf32>
    %34 = math.exp %33 : vector<8x8x256xf32>
    %35 = vector.extract_strided_slice %1 {offsets = [0, 0, 0], sizes = [8, 2, 8], strides = [1, 1, 1]} : vector<8x4x8xf32> to vector<8x2x8xf32>
    %36 = vector.shape_cast %35 : vector<8x2x8xf32> to vector<8x2x1x8xf32>
    %37 = vector.shape_cast %22 : vector<8x16x8xf32> to vector<8x1x16x8xf32>
    %38 = vector.broadcast %36 : vector<8x2x1x8xf32> to vector<8x2x16x8xf32>
    %39 = vector.broadcast %37 : vector<8x1x16x8xf32> to vector<8x2x16x8xf32>
    %40 = arith.mulf %38, %39 : vector<8x2x16x8xf32>
    %41 = vector.shape_cast %40 : vector<8x2x16x8xf32> to vector<8x32x8xf32>
    "tpu.trace_start"() <{level = 10 : i32, message = "azn,ang->azg"}> : () -> ()
    %cst_12 = arith.constant dense<0.000000e+00> : vector<8x32x256xf32>
    %42 = tpu.matmul %41, %34, %cst_12 {dimension_numbers = #tpu.dot_dimension_numbers<[2], [1], [1], [2], [0, 0, 0, 1, 1, 2], [0], [0]>} : vector<8x32x8xf32>, vector<8x8x256xf32>, vector<8x32x256xf32> -> vector<8x32x256xf32>
    "tpu.trace_stop"() : () -> ()
    %c0_13 = arith.constant 0 : index
    %c0_14 = arith.constant 0 : index
    %c0_15 = arith.constant 0 : index
    %43 = vector.load %arg5[%c0_13, %c0_14, %c0_15] : memref<8x64x256xf32, #tpu.memory_space<vmem>>, vector<8x32x256xf32>
    tpu.vector_store %arg5[%c0_13, %c0_14, %c0_15], %42 {strides = array<i32>} : memref<8x64x256xf32, #tpu.memory_space<vmem>>, vector<8x32x256xf32>,
    %c1 = arith.constant 1 : index
    %c0_16 = arith.constant 0 : index
    %c0_17 = arith.constant 0 : index
    %44 = vector.load %arg3[%c1, %c0_16, %c0_17] : memref<2x16x1xf32, #tpu.memory_space<vmem>>, vector<1x16x1xf32>
    %45 = vector.shape_cast %44 : vector<1x16x1xf32> to vector<16x1xf32>
    %46 = vector.shape_cast %45 : vector<16x1xf32> to vector<1x16x1xf32>
    %c1_18 = arith.constant 1 : index
    %c0_19 = arith.constant 0 : index
    %c0_20 = arith.constant 0 : index
    %47 = vector.load %arg4[%c1_18, %c0_19, %c0_20] : memref<2x2x256xf32, #tpu.memory_space<vmem>>, vector<1x2x256xf32>
    %48 = vector.shape_cast %47 : vector<1x2x256xf32> to vector<2x256xf32>
    %49 = vector.extract_strided_slice %48 {offsets = [0, 0], sizes = [1, 256], strides = [1, 1]} : vector<2x256xf32> to vector<1x256xf32>
    %50 = vector.shape_cast %49 : vector<1x256xf32> to vector<1x1x256xf32>
    %51 = vector.extract_strided_slice %48 {offsets = [1, 0], sizes = [1, 256], strides = [1, 1]} : vector<2x256xf32> to vector<1x256xf32>
    %52 = vector.shape_cast %51 : vector<1x256xf32> to vector<1x1x256xf32>
    %53 = vector.broadcast %46 : vector<1x16x1xf32> to vector<8x16x8xf32>
    %54 = vector.broadcast %4 : vector<8x1x8xf32> to vector<8x16x8xf32>
    %55 = arith.subf %53, %54 : vector<8x16x8xf32>
    %56 = arith.mulf %55, %55 : vector<8x16x8xf32>
    %cst_21 = arith.constant -1.125000e+00 : f32
    %57 = vector.broadcast %cst_21 : f32 to vector<8x16x8xf32>
    %58 = arith.mulf %57, %56 : vector<8x16x8xf32>
    %59 = math.exp %58 : vector<8x16x8xf32>
    %60 = vector.broadcast %50 : vector<1x1x256xf32> to vector<8x8x256xf32>
    %61 = vector.broadcast %5 : vector<8x8x1xf32> to vector<8x8x256xf32>
    %62 = arith.subf %60, %61 : vector<8x8x256xf32>
    %63 = vector.broadcast %52 : vector<1x1x256xf32> to vector<8x8x256xf32>
    %64 = vector.broadcast %6 : vector<8x8x1xf32> to vector<8x8x256xf32>
    %65 = arith.subf %63, %64 : vector<8x8x256xf32>
    %66 = arith.mulf %62, %62 : vector<8x8x256xf32>
    %67 = arith.mulf %65, %65 : vector<8x8x256xf32>
    %68 = arith.addf %66, %67 : vector<8x8x256xf32>
    %cst_22 = arith.constant -1.125000e+00 : f32
    %69 = vector.broadcast %cst_22 : f32 to vector<8x8x256xf32>
    %70 = arith.mulf %69, %68 : vector<8x8x256xf32>
    %71 = math.exp %70 : vector<8x8x256xf32>
    %72 = vector.extract_strided_slice %1 {offsets = [0, 2, 0], sizes = [8, 2, 8], strides = [1, 1, 1]} : vector<8x4x8xf32> to vector<8x2x8xf32>
    %73 = vector.shape_cast %72 : vector<8x2x8xf32> to vector<8x2x1x8xf32>
    %74 = vector.shape_cast %59 : vector<8x16x8xf32> to vector<8x1x16x8xf32>
    %75 = vector.broadcast %73 : vector<8x2x1x8xf32> to vector<8x2x16x8xf32>
    %76 = vector.broadcast %74 : vector<8x1x16x8xf32> to vector<8x2x16x8xf32>
    %77 = arith.mulf %75, %76 : vector<8x2x16x8xf32>
    %78 = vector.shape_cast %77 : vector<8x2x16x8xf32> to vector<8x32x8xf32>
    "tpu.trace_start"() <{level = 10 : i32, message = "azn,ang->azg"}> : () -> ()
    %cst_23 = arith.constant dense<0.000000e+00> : vector<8x32x256xf32>
    %79 = tpu.matmul %78, %71, %cst_23 {dimension_numbers = #tpu.dot_dimension_numbers<[2], [1], [1], [2], [0, 0, 0, 1, 1, 2], [0], [0]>} : vector<8x32x8xf32>, vector<8x8x256xf32>, vector<8x32x256xf32> -> vector<8x32x256xf32>
    "tpu.trace_stop"() : () -> ()
    %c0_24 = arith.constant 0 : index
    %c32 = arith.constant 32 : index
    %c0_25 = arith.constant 0 : index
    %80 = vector.load %arg5[%c0_24, %c32, %c0_25] : memref<8x64x256xf32, #tpu.memory_space<vmem>>, vector<8x32x256xf32>
    tpu.vector_store %arg5[%c0_24, %c32, %c0_25], %79 {strides = array<i32>} : memref<8x64x256xf32, #tpu.memory_space<vmem>>, vector<8x32x256xf32>,
    return
  }
  func.func @transform_0(%arg0: i32) -> (i32, i32, i32) {
    %c0_i32 = arith.constant 0 : i32
    %c0_i32_0 = arith.constant 0 : i32
    %c0_i32_1 = arith.constant 0 : i32
    return %arg0, %c0_i32, %c0_i32_0 : i32, i32, i32
  }
  func.func @transform_1(%arg0: i32) -> (i32, i32, i32) {
    %c0_i32 = arith.constant 0 : i32
    %c0_i32_0 = arith.constant 0 : i32
    %c0_i32_1 = arith.constant 0 : i32
    return %arg0, %c0_i32, %c0_i32_0 : i32, i32, i32
  }
  func.func @transform_2(%arg0: i32) -> (i32, i32, i32) {
    %c0_i32 = arith.constant 0 : i32
    %c0_i32_0 = arith.constant 0 : i32
    %c0_i32_1 = arith.constant 0 : i32
    %c0_i32_2 = arith.constant 0 : i32
    return %c0_i32, %c0_i32_0, %c0_i32_1 : i32, i32, i32
  }
  func.func @transform_3(%arg0: i32) -> (i32, i32, i32) {
    %c0_i32 = arith.constant 0 : i32
    %c0_i32_0 = arith.constant 0 : i32
    %c0_i32_1 = arith.constant 0 : i32
    %c0_i32_2 = arith.constant 0 : i32
    return %c0_i32, %c0_i32_0, %c0_i32_1 : i32, i32, i32
  }
  func.func @transform_4(%arg0: i32) -> (i32, i32, i32) {
    %c0_i32 = arith.constant 0 : i32
    %c0_i32_0 = arith.constant 0 : i32
    %c0_i32_1 = arith.constant 0 : i32
    return %arg0, %c0_i32, %c0_i32_0 : i32, i32, i32
  }
}

</mosaic_0001>

<bundles_post_ra>
// kernel: tpu_custom_call.1
= control target key start
LH: loop header
LB: loop body
LE: loop exit
PB: predicated region body
PF: predicated region fallthrough
CT: control target
= control target key end

     0   :  { %v79_v1 = vlaneseq  ;;  %v3183_v2 = vmov 2   ;;  %v3184_v3 = vmov 1   ;;  %s3914_s0 = inlined_call_operand.vmem [shape: f32[8,8,3], index: 0, kind: input, shape index: {}]   ;;  %s3915_s1 = inlined_call_operand.vmem [shape: f32[8,4,8], index: 1, kind: input, shape index: {}]   ;;  %s3916_s2 = inlined_call_operand.vmem [shape: f32[2,16,1], index: 2, kind: input, shape index: {}]   ;;  %s3917_s3 = inlined_call_operand.vmem [shape: f32[2,2,256], index: 3, kind: input, shape index: {}]   ;;  %s3918_s4 = inlined_call_operand.hbm [shape: f32[8,64,256], index: 4, kind: output, shape index: {}]  }
   0x1   :  { %v18_v0 = vld [vmem:[%s3914_s0] sm:$0xff]  ;;  %3013 = vset.pattern.permute.xlu0 %v3183_v2  ;;  %3012 = vset.pattern.permute.xlu1 %v3184_v3  ;;  %v19_v5 = vld [vmem:[%s3914_s0 + $0x8] sm:$0xff] }
   0x2   :  { %341 = vperm.xlu0 %3013, %v18_v0   ;;  %275 = vperm.xlu1 %3012, %v18_v0   ;;  %v3221_v4 = vshrl.u32 %v79_v1, 7  ;;  %v3230_v7 = vld [vmem:[%s3917_s3 + $0x4] sm:$0xf] }
   0x4   :  { %v328_v6 = vsub.s32 3, %v3221_v4 }
   0x5   :  { %9 = vsyncpa [#allocation3], 0  ;;  %v3185_v8 = vmov 0   ;;  %v3233_v9 = vsub.s32 1, %v3221_v4  ;;  %v35_v12 = vld [vmem:[%s3916_s2 + $0x8] sm:$0xff]  ;;  %v34_v13 = vld [vmem:[%s3916_s2] sm:$0xff] }
   0x6   :  { %279 = vperm.xlu1 %3012, %v19_v5   ;;  %3014 = vset.pattern.permute.xlu0 %v3185_v8  ;;  %v1790_v10 = vrot.slane %v3230_v7, %v328_v6  ;;  %v20_v14 = vld [vmem:[%s3914_s0 + $0x10] sm:$0xff]  ;;  %v21_v15 = vld [vmem:[%s3914_s0 + $0x18] sm:$0xff]  ;;  %v22_v16 = vld [vmem:[%s3914_s0 + $0x20] sm:$0xff]  ;;  %v3919_v20 = vmov 0.0   ;;  %v3284_v24 = vsub.s32 0, %v3221_v4  ;;  %v262_v25 = vsub.s32 2, %v3221_v4 }
   0x7   :  { %56 = vperm.xlu0 %3014, %v18_v0   ;;  %v23_v17 = vld [vmem:[%s3914_s0 + $0x28] sm:$0xff]  ;;  %v24_v18 = vld [vmem:[%s3914_s0 + $0x30] sm:$0xff]  ;;  %v25_v19 = vld [vmem:[%s3914_s0 + $0x38] sm:$0xff]  ;;  %857 = vmatprep.mubr.f32.mxu0 %v3919_v20  ;;  %v1786_v28 = vrot.slane %v3230_v7, %v3233_v9  ;;  %vm780_vm0 = vcmask 64512  }
   0x8   :  { %v3239_v11 = vrot.slane %v1790_v10, %v3233_v9  ;;  %958 = vmatprep.mubr.f32.mxu1 %v3919_v20  ;;  %v2969_v21 = vld [vmem:[%s3916_s2 + $0x10] sm:$0xff]  ;;  %v2970_v22 = vld [vmem:[%s3916_s2 + $0x18] sm:$0xff]  ;;  %v36_v23 = vld [vmem:[%s3917_s3] sm:$0xf]  ;;  %v1752_v31 = vrot.slane %v3230_v7, %v3284_v24  ;;  %v1756_v32 = vrot.slane %v3230_v7, %v262_v25  ;;  %v3187_v7 = vmov 1966171168  }
   0x9   :  { %v325_v26 = vrot.slane %v36_v23, %v3233_v9  ;;  %v329_v27 = vrot.slane %v36_v23, %v328_v6  ;;  %v259_v29 = vrot.slane %v36_v23, %v3284_v24  ;;  %v263_v30 = vrot.slane %v36_v23, %v262_v25 }
   0xa   :  { %3015 = vset.pattern.permute.xlu1 %v3183_v2  ;;  %v3303_v35 = vrot.slane %v1786_v28, %v3233_v9  ;;  %v3312_v38 = vrot.slane %v1752_v31, %v3284_v24  ;;  %v3315_v39 = vrot.slane %v1756_v32, %v3284_v24 }
   0xb   :  { %345 = vperm.xlu1 %3015, %v19_v5   ;;  %59 = vperm.xlu0 %3014, %v19_v5   ;;  %v3297_v33 = vrot.slane %v325_v26, %v3233_v9  ;;  %v3300_v34 = vrot.slane %v329_v27, %v3233_v9  ;;  %v3306_v36 = vrot.slane %v259_v29, %v3284_v24 }
   0xc   :  { %v3309_v37 = vrot.slane %v263_v30, %v3284_v24 }
   0xf   :  { %3016 = vset.pattern.permute.xlu1 %v3185_v8  ;;  %44 = vperm.xlu0 %3014, %v35_v12  }
  0x10   :  { %39 = vperm.xlu1 %3016, %v34_v13   ;;  %v80_v13 = vand.u32 127, %v79_v1 }
  0x12   :  { %v3345_v1 = vsub.s32 %v80_v13, %v3221_v4 }
  0x13   :  { %3017 = vset.pattern.permute.xlu0 %v3184_v3 }
  0x14   :  { %62 = vperm.xlu1 %3016, %v20_v14   ;;  %283 = vperm.xlu0 %3017, %v20_v14  }
  0x18   :  { %65 = vperm.xlu1 %3016, %v21_v15   ;;  %3020 = vset.pattern.permute.xlu0 %v3183_v2 }
  0x19   :  { %353 = vperm.xlu0 %3020, %v21_v15  }
  0x1c   :  { %3018 = vset.pattern.permute.xlu1 %v3184_v3 }
  0x1d   :  { %287 = vperm.xlu1 %3018, %v21_v15   ;;  %3022 = vset.pattern.permute.xlu0 %v3184_v3 }
  0x1e   :  { %291 = vperm.xlu0 %3022, %v22_v16  }
  0x21   :  { %3019 = vset.pattern.permute.xlu1 %v3183_v2 }
  0x22   :  { %349 = vperm.xlu1 %3019, %v20_v14   ;;  %3025 = vset.pattern.permute.xlu0 %v3183_v2 }
  0x23   :  { %361 = vperm.xlu0 %3025, %v23_v17  }
  0x26   :  { %3021 = vset.pattern.permute.xlu1 %v3185_v8 }
  0x27   :  { %68 = vperm.xlu1 %3021, %v22_v16   ;;  %3027 = vset.pattern.permute.xlu0 %v3184_v3 }
  0x28   :  { %299 = vperm.xlu0 %3027, %v24_v18  }
  0x2b   :  { %71 = vperm.xlu1 %3021, %v23_v17  }
  0x2c   :  { %3030 = vset.pattern.permute.xlu0 %v3183_v2 }
  0x2d   :  { %369 = vperm.xlu0 %3030, %v25_v19  }
  0x2f   :  { %3023 = vset.pattern.permute.xlu1 %v3184_v3 }
  0x30   :  { %295 = vperm.xlu1 %3023, %v23_v17  }
  0x31   :  { %3032 = vset.pattern.permute.xlu0 %v3185_v8 }
  0x34   :  { %3024 = vset.pattern.permute.xlu1 %v3183_v2 }
  0x35   :  { %357 = vperm.xlu1 %3024, %v22_v16  }
  0x39   :  { %3026 = vset.pattern.permute.xlu1 %v3185_v8 }
  0x3a   :  { %74 = vperm.xlu1 %3026, %v24_v18  }
  0x3e   :  { %77 = vperm.xlu1 %3026, %v25_v19  }
  0x42   :  { %3028 = vset.pattern.permute.xlu1 %v3184_v3 }
  0x43   :  { %303 = vperm.xlu1 %3028, %v25_v19  }
  0x47   :  { %3029 = vset.pattern.permute.xlu1 %v3183_v2 }
  0x48   :  { %365 = vperm.xlu1 %3029, %v24_v18  }
  0x4c   :  { %3031 = vset.pattern.permute.xlu1 %v3185_v8  ;;  %v501_v8 = vunpack.c.l.s4 %v3187_v7 }
  0x4d   :  { %1660 = vperm.xlu1 %3031, %v2969_v21  }
  0x4e   :  { %v502_v23 = vunpack.c.0.s8 %v501_v8 }
  0x50   :  { %v3348_v32 = vsub.s32 %v502_v23, %v3221_v4  ;;  %v3367_v4 = vld.sshfl [vmem:[%s3915_s1 + $0x4] sm:$0x33 pattern:$0x75316420] }
  0x51   :  { %1665 = vperm.xlu1 %3031, %v2970_v22  }
  0x7d   :  { %v342_v40 = vpop.permute.xlu0 %341  ;;  %v276_v41 = vpop.permute.xlu1 %275 }
  0x7e   :  { %v372_v42 = vsub.f32 %v3297_v33, %v342_v40  ;;  %v373_v43 = vsub.f32 %v3300_v34, %v342_v40  ;;  %v1801_v44 = vsub.f32 %v3303_v35, %v342_v40  ;;  %v1802_v45 = vsub.f32 %v3239_v11, %v342_v40  ;;  %v3353_v40 = vld.sshfl [vmem:[%s3915_s1] sm:$0x33 pattern:$0x75316420] }
  0x7f   :  { %v306_v46 = vsub.f32 %v3306_v36, %v276_v41  ;;  %v307_v47 = vsub.f32 %v3309_v37, %v276_v41  ;;  %v1767_v48 = vsub.f32 %v3312_v38, %v276_v41  ;;  %v1768_v49 = vsub.f32 %v3315_v39, %v276_v41 }
  0x80   :  { %v404_v50 = vmul.f32 %v372_v42, %v372_v42  ;;  %v405_v51 = vmul.f32 %v373_v43, %v373_v43  ;;  %v1833_v52 = vmul.f32 %v1801_v44, %v1801_v44  ;;  %v1834_v53 = vmul.f32 %v1802_v45, %v1802_v45 }
  0x81   :  { %v388_v54 = vmul.f32 %v306_v46, %v306_v46  ;;  %v389_v55 = vmul.f32 %v307_v47, %v307_v47  ;;  %v1817_v56 = vmul.f32 %v1767_v48, %v1767_v48  ;;  %v1818_v57 = vmul.f32 %v1768_v49, %v1768_v49  ;;  %v280_v58 = vpop.permute.xlu1 %279 }
  0x82   :  { %v1770_v59 = vsub.f32 %v3315_v39, %v280_v58  ;;  %v57_v60 = vpop.permute.xlu0 %56  ;;  %v1769_v0 = vsub.f32 %v3312_v38, %v280_v58  ;;  %v308_v27 = vsub.f32 %v3306_v36, %v280_v58  ;;  %v309_v45 = vsub.f32 %v3309_v37, %v280_v58 }
  0x83   :  { %v420_v61 = vadd.f32 %v404_v50, %v388_v54  ;;  %v3326_v62 = vadd.f32 %v1833_v52, %v1817_v56  ;;  %v3328_v63 = vadd.f32 %v1834_v53, %v1818_v57  ;;  %v421_v2 = vadd.f32 %v405_v51, %v389_v55 }
  0x84   :  { %v1819_v12 = vmul.f32 %v1769_v0, %v1769_v0  ;;  %v1820_v16 = vmul.f32 %v1770_v59, %v1770_v59  ;;  %v390_v41 = vmul.f32 %v308_v27, %v308_v27  ;;  %v3356_v42 = vrot.slane %v57_v60, %v3345_v1 }
  0x85   :  { %v436_v3 = vmul.f32 -3.125, %v420_v61  ;;  %v437_v14 = vmul.f32 -3.125, %v421_v2  ;;  %v3389_v58 = vrot.slane %v3353_v40, %v3348_v32  ;;  %v391_v59 = vmul.f32 %v309_v45, %v309_v45 }
  0x86   :  { %v346_v5 = vpop.permute.xlu1 %345  ;;  %v60_v6 = vpop.permute.xlu0 %59 }
  0x87   :  { %v1803_v9 = vsub.f32 %v3303_v35, %v346_v5  ;;  %v1804_v10 = vsub.f32 %v3239_v11, %v346_v5  ;;  %v452_v15 = vmul.f32 1.442695, %v436_v3  ;;  %v374_v21 = vsub.f32 %v3297_v33, %v346_v5  ;;  %3937 = vst [vmem:[#allocation7_spill] sm:$0xff] %v3389_v58 }
  0x88   :  { %v454_v28 = vmul.f32 1.442695, %v437_v14  ;;  %v3359_v43 = vrot.slane %v60_v6, %v3345_v1  ;;  %v375_v46 = vsub.f32 %v3300_v34, %v346_v5 }
  0x89   :  { %v1835_v17 = vmul.f32 %v1803_v9, %v1803_v9  ;;  %v1836_v18 = vmul.f32 %v1804_v10, %v1804_v10  ;;  %3033 = vpow2.f32 %v452_v15  ;;  %v406_v29 = vmul.f32 %v374_v21, %v374_v21 }
  0x8a   :  { %v3334_v19 = vpop.permute.xlu0 %44  ;;  %3035 = vpow2.f32 %v454_v28  ;;  %v407_v60 = vmul.f32 %v375_v46, %v375_v46 }
  0x8b   :  { %v3337_v22 = vpop.permute.xlu1 %39  ;;  %v3339_v25 = vadd.f32 %v1835_v17, %v1819_v12  ;;  %v3341_v26 = vadd.f32 %v1836_v18, %v1820_v16  ;;  %v422_v47 = vadd.f32 %v406_v29, %v390_v41  ;;  %v176_v48 = vsub.f32 %v3334_v19, %v3356_v42 }
  0x8c   :  { %v175_v55 = vsub.f32 %v3337_v22, %v3356_v42  ;;  %v177_v56 = vsub.f32 %v3337_v22, %v3359_v43  ;;  %v178_v3 = vsub.f32 %v3334_v19, %v3359_v43 }
  0x8d   :  { %v438_v2 = vmul.f32 -3.125, %v422_v47  ;;  %v3396_v5 = vmul.f32 %v176_v48, %v176_v48 }
  0x8e   :  { %v191_v13 = vmul.f32 %v175_v55, %v175_v55  ;;  %v193_v14 = vmul.f32 %v177_v56, %v177_v56 }
  0x8f   :  { %v63_v30 = vpop.permute.xlu1 %62  ;;  %v284_v31 = vpop.permute.xlu0 %283 }
  0x90   :  { %v3362_v44 = vrot.slane %v63_v30, %v3345_v1  ;;  %v1772_v51 = vsub.f32 %v3315_v39, %v284_v31  ;;  %v310_v0 = vsub.f32 %v3306_v36, %v284_v31  ;;  %v311_v7 = vsub.f32 %v3309_v37, %v284_v31 }
  0x91   :  { %v1771_v8 = vsub.f32 %v3312_v38, %v284_v31 }
  0x92   :  { %3935 = vst [vmem:[#allocation5_spill] sm:$0xff] %v3362_v44  ;;  %v179_v57 = vsub.f32 %v3337_v22, %v3362_v44  ;;  %v392_v21 = vmul.f32 %v310_v0, %v310_v0  ;;  %v393_v45 = vmul.f32 %v311_v7, %v311_v7 }
  0x93   :  { %v66_v49 = vpop.permute.xlu1 %65  ;;  %v1821_v46 = vmul.f32 %v1771_v8, %v1771_v8 }
  0x94   :  { %v3374_v50 = vrot.slane %v66_v49, %v3345_v1  ;;  %v354_v52 = vpop.permute.xlu0 %353  ;;  %v195_v15 = vmul.f32 %v179_v57, %v179_v57 }
  0x95   :  { %v379_v6 = vsub.f32 %v3300_v34, %v354_v52  ;;  %v1807_v9 = vsub.f32 %v3303_v35, %v354_v52  ;;  %v1808_v10 = vsub.f32 %v3239_v11, %v354_v52  ;;  %v378_v16 = vsub.f32 %v3297_v33, %v354_v52 }
  0x96   :  { %3936 = vst [vmem:[#allocation6_spill] sm:$0xff] %v3374_v50  ;;  %v181_v61 = vsub.f32 %v3337_v22, %v3374_v50  ;;  %v182_v17 = vsub.f32 %v3334_v19, %v3374_v50  ;;  %v3034_v27 = vpop.eup %3033  ;;  %v211_v49 = vmul.f32 -3.125, %v195_v15 }
  0x97   :  { %v411_v23 = vmul.f32 %v379_v6, %v379_v6  ;;  %v1839_v28 = vmul.f32 %v1807_v9, %v1807_v9  ;;  %v3036_v41 = vpop.eup %3035  ;;  %v1840_v47 = vmul.f32 %v1808_v10, %v1808_v10  ;;  %v410_v52 = vmul.f32 %v378_v16, %v378_v16 }
  0x98   :  { %v288_v12 = vpop.permute.xlu1 %287  ;;  %v197_v18 = vmul.f32 %v181_v61, %v181_v61  ;;  %823 = vmatprep.subr.mxu0 %v3036_v41  ;;  %v198_v61 = vmul.f32 %v182_v17, %v182_v17  ;;  %v180_v41 = vsub.f32 %v3334_v19, %v3362_v44 }
  0x99   :  { %v312_v29 = vsub.f32 %v3306_v36, %v288_v12  ;;  %v313_v30 = vsub.f32 %v3309_v37, %v288_v12  ;;  %v1773_v31 = vsub.f32 %v3312_v38, %v288_v12  ;;  %v1774_v48 = vsub.f32 %v3315_v39, %v288_v12  ;;  %824 = vmatpush1.msra.mxu0 %v3034_v27 }
  0x9a   :  { %v213_v20 = vmul.f32 -3.125, %v197_v18  ;;  %v423_v27 = vadd.f32 %v407_v60, %v391_v59  ;;  %v209_v60 = vmul.f32 -3.125, %v193_v14  ;;  %v3941_v14 = vcombine.high %v3353_v40, %v3353_v40 }
  0x9b   :  { %v395_v55 = vmul.f32 %v313_v30, %v313_v30  ;;  %v1823_v56 = vmul.f32 %v1773_v31, %v1773_v31  ;;  %v1824_v0 = vmul.f32 %v1774_v48, %v1774_v48  ;;  %v394_v54 = vmul.f32 %v312_v29, %v312_v29 }
  0x9c   :  { %v456_v30 = vmul.f32 1.442695, %v438_v2  ;;  %v1822_v31 = vmul.f32 %v1772_v51, %v1772_v51  ;;  %v214_v48 = vmul.f32 -3.125, %v198_v61  ;;  %v207_v51 = vmul.f32 -3.125, %v191_v13 }
  0x9d   :  { %v350_v57 = vpop.permute.xlu1 %349  ;;  %v427_v7 = vadd.f32 %v411_v23, %v395_v55  ;;  %v3412_v8 = vadd.f32 %v1839_v28, %v1823_v56  ;;  %v3414_v10 = vadd.f32 %v1840_v47, %v1824_v0  ;;  %v231_v28 = vmul.f32 1.442695, %v211_v49 }
  0x9e   :  { %v376_v6 = vsub.f32 %v3297_v33, %v350_v57  ;;  %v377_v9 = vsub.f32 %v3300_v34, %v350_v57  ;;  %v1805_v16 = vsub.f32 %v3303_v35, %v350_v57  ;;  %v1806_v17 = vsub.f32 %v3239_v11, %v350_v57 }
  0x9f   :  { %3938 = vst [vmem:[#allocation8_spill] sm:$0xff] %v3412_v8  ;;  %v426_v55 = vadd.f32 %v410_v52, %v394_v54  ;;  %v443_v47 = vmul.f32 -3.125, %v427_v7  ;;  %v235_v0 = vmul.f32 1.442695, %v213_v20  ;;  %v194_v2 = vmul.f32 %v178_v3, %v178_v3 }
  0xa0   :  { %v408_v12 = vmul.f32 %v376_v6, %v376_v6  ;;  %v409_v15 = vmul.f32 %v377_v9, %v377_v9  ;;  %v1837_v29 = vmul.f32 %v1805_v16, %v1805_v16  ;;  %v1838_v56 = vmul.f32 %v1806_v17, %v1806_v17  ;;  %v292_v16 = vpop.permute.xlu0 %291 }
  0xa1   :  { %v439_v59 = vmul.f32 -3.125, %v423_v27  ;;  %3037 = vpow2.f32 %v456_v30  ;;  %v237_v61 = vmul.f32 1.442695, %v214_v48  ;;  %v196_v49 = vmul.f32 %v180_v41, %v180_v41 }
  0xa2   :  { %v425_v18 = vadd.f32 %v409_v15, %v393_v45  ;;  %v69_v23 = vpop.permute.xlu1 %68  ;;  %v424_v6 = vadd.f32 %v408_v12, %v392_v21  ;;  %v3420_v53 = vadd.f32 %v1837_v29, %v1821_v46  ;;  %v3422_v57 = vadd.f32 %v1838_v56, %v1822_v31 }
  0xa3   :  { %3039 = vpow2.f32 %v231_v28  ;;  %v442_v54 = vmul.f32 -3.125, %v426_v55  ;;  %v466_v52 = vmul.f32 1.442695, %v443_v47  ;;  %v458_v21 = vmul.f32 1.442695, %v439_v59 }
  0xa4   :  { %v441_v9 = vmul.f32 -3.125, %v425_v18  ;;  %3939 = vst [vmem:[#allocation9_spill] sm:$0xff] %v3420_v53  ;;  %3041 = vpow2.f32 %v235_v0  ;;  %v440_v20 = vmul.f32 -3.125, %v424_v6  ;;  %v3426_v13 = vrot.slane %v3367_v4, %v3348_v32  ;;  %v362_v29 = vpop.permute.xlu0 %361 }
  0xa5   :  { %v223_v3 = vmul.f32 1.442695, %v207_v51  ;;  %v208_v46 = vmul.f32 -3.125, %v3396_v5  ;;  %v3433_v7 = vrot.slane %v3941_v14, %v3348_v32  ;;  %v227_v12 = vmul.f32 1.442695, %v209_v60 }
  0xa6   :  { %v462_v45 = vmul.f32 1.442695, %v441_v9  ;;  %v72_v15 = vpop.permute.xlu1 %71  ;;  %3940 = vst [vmem:[#allocation10_spill] sm:$0xff] %v3426_v13  ;;  %v210_v30 = vmul.f32 -3.125, %v194_v2  ;;  %v3943_v31 = vcombine.high %v3367_v4, %v3367_v4  ;;  %v212_v27 = vmul.f32 -3.125, %v196_v49 }
  0xa7   :  { %3942 = vst [vmem:[#allocation11_spill] sm:$0xff] %v3433_v7  ;;  %v464_v41 = vmul.f32 1.442695, %v442_v54  ;;  %v3443_v5 = vrot.slane %v3389_v58, %v3284_v24  ;;  %v460_v48 = vmul.f32 1.442695, %v440_v20  ;;  %v3446_v40 = vrot.slane %v69_v23, %v3345_v1 }
  0xa8   :  { %3043 = vpow2.f32 %v462_v45  ;;  %v3439_v17 = vrot.slane %v3943_v31, %v3348_v32  ;;  %v3449_v18 = vrot.slane %v72_v15, %v3345_v1  ;;  %v225_v4 = vmul.f32 1.442695, %v208_v46 }
  0xa9   :  { %3045 = vpow2.f32 %v237_v61  ;;  %3945 = vst [vmem:[#allocation13_spill] sm:$0xff] %v3446_v40  ;;  %v314_v55 = vsub.f32 %v3306_v36, %v292_v16  ;;  %v315_v47 = vsub.f32 %v3309_v37, %v292_v16  ;;  %v229_v56 = vmul.f32 1.442695, %v210_v30 }
  0xaa   :  { %3944 = vst [vmem:[#allocation12_spill] sm:$0xff] %v3439_v17  ;;  %3047 = vpow2.f32 %v466_v52  ;;  %v3455_v0 = vrot.slane %v3426_v13, %v3284_v24  ;;  %v1775_v23 = vsub.f32 %v3312_v38, %v292_v16  ;;  %v3458_v6 = vmul.f32 1.442695, %v212_v27 }
  0xab   :  { %3049 = vpow2.f32 %v458_v21  ;;  %v296_v28 = vpop.permute.xlu1 %295  ;;  %v1776_v9 = vsub.f32 %v3315_v39, %v292_v16  ;;  %v382_v51 = vsub.f32 %v3297_v33, %v362_v29  ;;  %v183_v2 = vsub.f32 %v3337_v22, %v3446_v40 }
  0xac   :  { %3051 = vpow2.f32 %v223_v3  ;;  %v3466_v59 = vsub.f32 %v3337_v22, %v3449_v18  ;;  %v383_v60 = vsub.f32 %v3300_v34, %v362_v29  ;;  %v396_v61 = vmul.f32 %v314_v55, %v314_v55 }
  0xad   :  { %3053 = vpow2.f32 %v227_v12  ;;  %v397_v45 = vmul.f32 %v315_v47, %v315_v47  ;;  %v1811_v15 = vsub.f32 %v3303_v35, %v362_v29  ;;  %v1825_v49 = vmul.f32 %v1775_v23, %v1775_v23 }
  0xae   :  { %3055 = vpow2.f32 %v464_v41  ;;  %v414_v16 = vmul.f32 %v382_v51, %v382_v51  ;;  %v1812_v54 = vsub.f32 %v3239_v11, %v362_v29  ;;  %v316_v52 = vsub.f32 %v3306_v36, %v296_v28  ;;  %v3038_v21 = vpop.eup %3037 }
  0xaf   :  { %3057 = vpow2.f32 %v460_v48  ;;  %v415_v3 = vmul.f32 %v383_v60, %v383_v60  ;;  %v1843_v46 = vmul.f32 %v1811_v15, %v1811_v15  ;;  %v317_v14 = vsub.f32 %v3309_v37, %v296_v28 }
  0xb0   :  { %3059 = vpow2.f32 %v225_v4  ;;  %v358_v20 = vpop.permute.xlu1 %357  ;;  %v1777_v12 = vsub.f32 %v3312_v38, %v296_v28  ;;  %v3474_v30 = vpop.eup %3039  ;;  %v1844_v31 = vmul.f32 %v1812_v54, %v1812_v54  ;;  %v398_v27 = vmul.f32 %v316_v52, %v316_v52 }
  0xb1   :  { %3061 = vpow2.f32 %v229_v56  ;;  %v1778_v41 = vsub.f32 %v3315_v39, %v296_v28  ;;  %v3477_v48 = vpop.eup %3041  ;;  %v399_v29 = vmul.f32 %v317_v14, %v317_v14  ;;  %v380_v55 = vsub.f32 %v3297_v33, %v358_v20 }
  0xb2   :  { %v1827_v4 = vmul.f32 %v1777_v12, %v1777_v12  ;;  %v381_v47 = vsub.f32 %v3300_v34, %v358_v20  ;;  %v430_v51 = vadd.f32 %v414_v16, %v398_v27  ;;  %v1809_v15 = vsub.f32 %v3303_v35, %v358_v20  ;;  %v2931_v16 = vld.sshfl [vmem:[%s3915_s1 + $0x8] sm:$0x33 pattern:$0x75316420] }
  0xb3   :  { %v1828_v60 = vmul.f32 %v1778_v41, %v1778_v41  ;;  %v1810_v58 = vsub.f32 %v3239_v11, %v358_v20  ;;  %v431_v54 = vadd.f32 %v415_v3, %v399_v29  ;;  %v412_v28 = vmul.f32 %v380_v55, %v380_v55 }
  0xb4   :  { %v3485_v52 = vadd.f32 %v1843_v46, %v1827_v4  ;;  %v413_v13 = vmul.f32 %v381_v47, %v381_v47  ;;  %v1826_v12 = vmul.f32 %v1776_v9, %v1776_v9  ;;  %v1841_v53 = vmul.f32 %v1809_v15, %v1809_v15  ;;  %v2932_v46 = vld.sshfl [vmem:[%s3915_s1 + $0xc] sm:$0x33 pattern:$0x75316420] }
  0xb5   :  { %v3044_v23 = vpop.eup %3043  ;;  %v3487_v44 = vadd.f32 %v1844_v31, %v1828_v60  ;;  %v1842_v50 = vmul.f32 %v1810_v58, %v1810_v58  ;;  %v446_v20 = vmul.f32 -3.125, %v430_v51  ;;  %v447_v41 = vmul.f32 -3.125, %v431_v54  ;;  %v3501_v55 = vpop.permute.xlu1 %74 }
  0xb6   :  { %v3483_v56 = vpop.eup %3045  ;;  %1025 = vmatprep.subr.mxu0 %v3044_v23  ;;  %v428_v8 = vadd.f32 %v412_v28, %v396_v61  ;;  %v429_v3 = vadd.f32 %v413_v13, %v397_v45  ;;  %v199_v9 = vmul.f32 %v183_v2, %v183_v2  ;;  %v186_v31 = vsub.f32 %v3334_v19, %v3449_v18 }
  0xb7   :  { %v3048_v14 = vpop.eup %3047  ;;  %v3497_v58 = vadd.f32 %v1841_v53, %v1825_v49  ;;  %v3499_v4 = vadd.f32 %v1842_v50, %v1826_v12  ;;  %v474_v61 = vmul.f32 1.442695, %v447_v41  ;;  %v3507_v45 = vrot.slane %v2932_v46, %v3348_v32 }
  0xb8   :  { %v3050_v27 = vpop.eup %3049  ;;  %v543_v23 = vcombine.high %v2931_v16, %v2931_v16  ;;  %v184_v51 = vsub.f32 %v3334_v19, %v3446_v40  ;;  %v201_v53 = vmul.f32 %v3466_v59, %v3466_v59  ;;  %v565_v49 = vcombine.high %v2932_v46, %v2932_v46 }
  0xb9   :  { %v3052_v29 = vpop.eup %3051  ;;  %924 = vmatprep.subr.mxu1 %v3050_v27  ;;  %3946 = vst [vmem:[#allocation14_spill] sm:$0xff] %v3497_v58  ;;  %3947 = vst [vmem:[#allocation15_spill] sm:$0xff] %v3507_v45  ;;  %v472_v60 = vmul.f32 1.442695, %v446_v20  ;;  %3063 = vpow2.f32 %v474_v61  ;;  %v444_v15 = vmul.f32 -3.125, %v428_v8  ;;  %v445_v54 = vmul.f32 -3.125, %v429_v3  ;;  %v3525_v3 = vpop.permute.xlu0 %299 }
  0xba   :  { %v3503_v47 = vpop.eup %3053  ;;  %925 = vmatpush1.msra.mxu1 %v3038_v21  ;;  %v748_v13 = vmul.f32 %v3052_v29, %v3443_v5  ;;  %3065 = vpow2.f32 %v3458_v6  ;;  %v215_v12 = vmul.f32 -3.125, %v199_v9  ;;  %v202_v27 = vmul.f32 %v186_v31, %v186_v31  ;;  %v78_v9 = vpop.permute.xlu1 %77 }
  0xbb   :  { %v3056_v2 = vpop.eup %3055  ;;  %v752_v50 = vmul.f32 %v3503_v47, %v3455_v0  ;;  %1126 = vmatprep.subr.mxu1 %v3048_v14  ;;  %v3948_v41 = vmov 0.0   ;;  %v675_v14 = vrot.slane %v3433_v7, %v3284_v24  ;;  %v683_v8 = vrot.slane %v3439_v17, %v3284_v24 }
  0xbc   :  { %v3058_v21 = vpop.eup %3057  ;;  %2937 = vmatmul.mubr.msk.f32.vlgmr.msra.gmra.mxu0 %vm780_vm0, %v748_v13  ;;  %v468_v20 = vmul.f32 1.442695, %v444_v15  ;;  %v470_v6 = vmul.f32 1.442695, %v445_v54  ;;  %v3528_v46 = vrot.slane %v2931_v16, %v3348_v32  ;;  %v3531_v31 = vrot.slane %v565_v49, %v3348_v32 }
  0xbd   :  { %v3060_v28 = vpop.eup %3059  ;;  %2941 = vmatmul.mubr.msk.f32.vlgmr.msra.gmra.mxu1 %vm780_vm0, %v752_v50  ;;  %863 = vmatprep.mubr.f32.mxu0 %v3948_v41  ;;  %v200_v61 = vmul.f32 %v184_v51, %v184_v51  ;;  %v217_v50 = vmul.f32 -3.125, %v201_v53  ;;  %3067 = vpow2.f32 %v472_v60  ;;  %v218_v15 = vmul.f32 -3.125, %v202_v27 }
  0xbe   :  { %964 = vmatprep.mubr.f32.mxu1 %v3948_v41  ;;  %v749_v59 = vmul.f32 %v3060_v28, %v3443_v5  ;;  %1127 = vmatpush1.msra.mxu1 %v3056_v2  ;;  %3949 = vst [vmem:[#allocation16_spill] sm:$0xff] %v3528_v46  ;;  %3950 = vst [vmem:[#allocation17_spill] sm:$0xff] %v3531_v31  ;;  %v3534_v5 = vrot.slane %v543_v23, %v3348_v32  ;;  %v3062_v13 = vpop.eup %3061  ;;  %3069 = vpow2.f32 %v470_v6  ;;  %v3544_v23 = vld.sshfl [vmem:[%s3915_s1 + $0x14] sm:$0x33 pattern:$0x75316420] }
  0xbf   :  { %1026 = vmatpush1.msra.mxu0 %v3058_v21  ;;  %v695_v2 = vrot.slane %v3507_v45, %v3284_v24  ;;  %v239_v21 = vmul.f32 1.442695, %v215_v12  ;;  %v753_v16 = vmul.f32 %v3062_v13, %v3455_v0  ;;  %v750_v49 = vmul.f32 %v3052_v29, %v675_v14 }
  0xc0   :  { %3951 = vst [vmem:[#allocation18_spill] sm:$0xff] %v3534_v5  ;;  %2938 = vmatmul.mubr.msk.f32.gmra.mxu0 %vm780_vm0, %v749_v59  ;;  %3071 = vpow2.f32 %v468_v20  ;;  %v687_v51 = vrot.slane %v3528_v46, %v3284_v24  ;;  %v3551_v53 = vrot.slane %v3531_v31, %v3284_v24  ;;  %v3555_v0 = vrot.slane %v3534_v5, %v3284_v24  ;;  %v370_v59 = vpop.permute.xlu0 %369 }
  0xc1   :  { %869 = vmatprep.mubr.f32.mxu0 %v3948_v41  ;;  %2942 = vmatmul.mubr.msk.f32.gmra.mxu1 %vm780_vm0, %v753_v16  ;;  %v3559_v29 = vrot.slane %v3544_v23, %v3348_v32  ;;  %v3562_v60 = vmul.f32 -1.125, %v3341_v26  ;;  %v3564_v54 = vmul.f32 -3.125, %v200_v61  ;;  %v243_v12 = vmul.f32 1.442695, %v217_v50  ;;  %v304_v16 = vpop.permute.xlu1 %303 }
  0xc2   :  { %970 = vmatprep.mubr.f32.mxu1 %v3948_v41  ;;  %v3569_v27 = vrot.slane %v78_v9, %v3345_v1  ;;  %3073 = vpow2.f32 %v239_v21  ;;  %v245_v20 = vmul.f32 1.442695, %v218_v15  ;;  %v754_v6 = vmul.f32 %v3503_v47, %v683_v8 }
  0xc3   :  { %v760_v26 = vmul.f32 %v3477_v48, %v695_v2  ;;  %v751_v61 = vmul.f32 %v3060_v28, %v675_v14  ;;  %v3576_v50 = vrot.slane %v3501_v55, %v3345_v1  ;;  %v319_v9 = vsub.f32 %v3309_v37, %v3525_v3 }
  0xc4   :  { %2939 = vmatmul.mubr.msk.f32.gmra.mxu0 %vm780_vm0, %v750_v49  ;;  %v318_v49 = vsub.f32 %v3306_v36, %v3525_v3  ;;  %v755_v21 = vmul.f32 %v3062_v13, %v683_v8  ;;  %v756_v47 = vmul.f32 %v3474_v30, %v687_v51  ;;  %v3585_v15 = vmul.f32 %v3483_v56, %v695_v2 }
  0xc5   :  { %875 = vmatprep.mubr.f32.mxu0 %v3948_v41  ;;  %2943 = vmatmul.mubr.msk.f32.gmra.mxu1 %vm780_vm0, %v754_v6  ;;  %v386_v28 = vsub.f32 %v3297_v33, %v370_v59  ;;  %3075 = vpow2.f32 %v243_v12  ;;  %v3592_v1 = vsub.f32 %v3337_v22, %v3569_v27  ;;  %v1779_v55 = vsub.f32 %v3312_v38, %v3525_v3 }
  0xc6   :  { %976 = vmatprep.mubr.f32.mxu1 %v3948_v41  ;;  %v387_v14 = vsub.f32 %v3300_v34, %v370_v59  ;;  %v3064_v8 = vpop.eup %3063  ;;  %v1815_v2 = vsub.f32 %v3303_v35, %v370_v59  ;;  %v1816_v12 = vsub.f32 %v3239_v11, %v370_v59  ;;  %v320_v6 = vsub.f32 %v3306_v36, %v304_v16  ;;  %v366_v59 = vpop.permute.xlu1 %365 }
  0xc7   :  { %v418_v13 = vmul.f32 %v386_v28, %v386_v28  ;;  %v400_v5 = vmul.f32 %v318_v49, %v318_v49  ;;  %v401_v31 = vmul.f32 %v319_v9, %v319_v9  ;;  %v321_v45 = vsub.f32 %v3309_v37, %v304_v16  ;;  %1328 = vmatprep.subr.mxu1 %v3064_v8 }
  0xc8   :  { %2940 = vmatmul.mubr.msk.f32.gmra.mxu0 %vm780_vm0, %v751_v61  ;;  %v3601_v61 = vpop.eup %3065  ;;  %v419_v46 = vmul.f32 %v387_v14, %v387_v14  ;;  %v1780_v7 = vsub.f32 %v3315_v39, %v3525_v3  ;;  %v1847_v28 = vmul.f32 %v1815_v2, %v1815_v2  ;;  %v402_v40 = vmul.f32 %v320_v6, %v320_v6 }
  0xc9   :  { %1059 = vmatprep.mubr.f32.mxu0 %v3948_v41  ;;  %2944 = vmatmul.mubr.msk.f32.gmra.mxu1 %vm780_vm0, %v755_v21  ;;  %v1781_v58 = vsub.f32 %v3312_v38, %v304_v16  ;;  %3077 = vpow2.f32 %v245_v20  ;;  %v1848_v36 = vmul.f32 %v1816_v12, %v1816_v12  ;;  %v403_v49 = vmul.f32 %v321_v45, %v321_v45 }
  0xca   :  { %1160 = vmatprep.mubr.f32.mxu1 %v3948_v41  ;;  %v1782_v37 = vsub.f32 %v3315_v39, %v304_v16  ;;  %v3068_v9 = vpop.eup %3067  ;;  %v1829_v14 = vmul.f32 %v1779_v55, %v1779_v55  ;;  %v757_v3 = vmul.f32 %v3601_v61, %v687_v51  ;;  %v434_v21 = vadd.f32 %v418_v13, %v402_v40 }
  0xcb   :  { %v1831_v8 = vmul.f32 %v1781_v58, %v1781_v58  ;;  %v3070_v2 = vpop.eup %3069  ;;  %v435_v38 = vadd.f32 %v419_v46, %v403_v49  ;;  %v384_v20 = vsub.f32 %v3297_v33, %v366_v59  ;;  %v385_v17 = vsub.f32 %v3300_v34, %v366_v59 }
  0xcc   :  { %2945 = vmatmul.mubr.msk.f32.vlgmr.msra.gmra.mxu0 %vm780_vm0, %v756_v47  ;;  %v1832_v6 = vmul.f32 %v1782_v37, %v1782_v37  ;;  %v450_v45 = vmul.f32 -3.125, %v434_v21  ;;  %v1813_v16 = vsub.f32 %v3303_v35, %v366_v59  ;;  %v1814_v55 = vsub.f32 %v3239_v11, %v366_v59  ;;  %1227 = vmatprep.subr.mxu0 %v3070_v2 }
  0xcd   :  { %1065 = vmatprep.mubr.f32.mxu0 %v3948_v41  ;;  %v3072_v47 = vpop.eup %3071  ;;  %2949 = vmatmul.mubr.msk.f32.vlgmr.msra.gmra.mxu1 %vm780_vm0, %v760_v26  ;;  %v3616_v39 = vadd.f32 %v1847_v28, %v1831_v8  ;;  %v451_v40 = vmul.f32 -3.125, %v435_v38  ;;  %v416_v33 = vmul.f32 %v384_v20, %v384_v20  ;;  %v417_v34 = vmul.f32 %v385_v17, %v385_v17 }
  0xce   :  { %1166 = vmatprep.mubr.f32.mxu1 %v3948_v41  ;;  %v3622_v58 = vadd.f32 %v1848_v36, %v1832_v6  ;;  %v1830_v46 = vmul.f32 %v1780_v7, %v1780_v7  ;;  %v480_v51 = vmul.f32 1.442695, %v450_v45  ;;  %v1845_v26 = vmul.f32 %v1813_v16, %v1813_v16  ;;  %1329 = vmatpush1.msra.mxu1 %v3068_v9 }
  0xcf   :  { %v1846_v13 = vmul.f32 %v1814_v55, %v1814_v55  ;;  %v3625_v35 = vpop.eup %3073  ;;  %v482_v11 = vmul.f32 1.442695, %v451_v40  ;;  %v758_v12 = vmul.f32 %v3474_v30, %v3555_v0  ;;  %v432_v28 = vadd.f32 %v416_v33, %v400_v5  ;;  %1228 = vmatpush1.msra.mxu0 %v3072_v47 }
  0xd0   :  { %2946 = vmatmul.mubr.msk.f32.gmra.mxu0 %vm780_vm0, %v757_v3  ;;  %v433_v59 = vadd.f32 %v417_v34, %v401_v31  ;;  %v1866_v36 = vmul.f32 -1.125, %v3328_v63  ;;  %v1887_v17 = vmul.f32 1.442695, %v3562_v60  ;;  %v3633_v7 = vadd.f32 %v1845_v26, %v1829_v14 }
  0xd1   :  { %1071 = vmatprep.mubr.f32.mxu0 %v3948_v41  ;;  %2950 = vmatmul.mubr.msk.f32.gmra.mxu1 %vm780_vm0, %v3585_v15  ;;  %v3635_v49 = vadd.f32 %v1846_v13, %v1830_v46  ;;  %v190_v37 = vsub.f32 %v3334_v19, %v3569_v27  ;;  %3079 = vpow2.f32 %v482_v11  ;;  %v448_v30 = vmul.f32 -3.125, %v432_v28 }
  0xd2   :  { %1172 = vmatprep.mubr.f32.mxu1 %v3948_v41  ;;  %v449_v31 = vmul.f32 -3.125, %v433_v59  ;;  %v3641_v63 = vpop.eup %3075  ;;  %v241_v5 = vmul.f32 1.442695, %v3564_v54  ;;  %v205_v60 = vmul.f32 %v3592_v1, %v3592_v1  ;;  %v762_v15 = vmul.f32 %v3477_v48, %v3551_v53 }
  0xd3   :  { %3081 = vpow2.f32 %v480_v51  ;;  %v187_v9 = vsub.f32 %v3337_v22, %v3576_v50  ;;  %v476_v14 = vmul.f32 1.442695, %v448_v30  ;;  %v759_v21 = vmul.f32 %v3601_v61, %v3555_v0  ;;  %v2933_v22 = vld.sshfl [vmem:[%s3915_s1 + $0x10] sm:$0x33 pattern:$0x75316420] }
  0xd4   :  { %2947 = vmatmul.mubr.msk.f32.gmra.mxu0 %vm780_vm0, %v758_v12  ;;  %v478_v3 = vmul.f32 1.442695, %v449_v31  ;;  %v1883_v8 = vmul.f32 1.442695, %v1866_v36  ;;  %3083 = vpow2.f32 %v1887_v17  ;;  %v206_v54 = vmul.f32 %v190_v37, %v190_v37 }
  0xd5   :  { %1077 = vmatprep.mubr.f32.mxu0 %v3948_v41  ;;  %2951 = vmatmul.mubr.msk.f32.gmra.mxu1 %vm780_vm0, %v762_v15  ;;  %3085 = vpow2.f32 %v476_v14  ;;  %v711_v48 = vrot.slane %v3559_v29, %v3284_v24  ;;  %v221_v0 = vmul.f32 -3.125, %v205_v60  ;;  %v763_v61 = vmul.f32 %v3483_v56, %v3551_v53  ;;  %v3674_v56 = vpop.permute.xlu1 %1660 }
  0xd6   :  { %1178 = vmatprep.mubr.f32.mxu1 %v3948_v41  ;;  %v3661_v1 = vpop.eup %3077  ;;  %3087 = vpow2.f32 %v478_v3  ;;  %v3667_v2 = vrot.slane %v2933_v22, %v3348_v32  ;;  %v188_v38 = vsub.f32 %v3334_v19, %v3576_v50  ;;  %v203_v6 = vmul.f32 %v187_v9, %v187_v9 }
  0xd7   :  { %3089 = vpow2.f32 %v241_v5  ;;  %v1867_v20 = vmul.f32 -1.125, %v3339_v25  ;;  %v222_v47 = vmul.f32 -3.125, %v206_v54  ;;  %v609_v53 = vcombine.high %v3544_v23, %v3544_v23 }
  0xd8   :  { %2948 = vmatmul.mubr.msk.f32.gmra.mxu0 %vm780_vm0, %v759_v21  ;;  %3091 = vpow2.f32 %v1883_v8  ;;  %v251_v45 = vmul.f32 1.442695, %v221_v0  ;;  %v768_v16 = vmul.f32 %v3641_v63, %v711_v48  ;;  %v703_v19 = vrot.slane %v3667_v2, %v3284_v24 }
  0xd9   :  { %1261 = vmatprep.mubr.f32.mxu0 %v3948_v41  ;;  %2952 = vmatmul.mubr.msk.f32.gmra.mxu1 %vm780_vm0, %v763_v61  ;;  %v204_v55 = vmul.f32 %v188_v38, %v188_v38  ;;  %v219_v40 = vmul.f32 -3.125, %v203_v6  ;;  %v1872_v33 = vmul.f32 -1.125, %v3414_v10  ;;  %v1885_v25 = vmul.f32 1.442695, %v1867_v20  ;;  %v3691_v59 = vpop.permute.xlu1 %1665 }
  0xda   :  { %1362 = vmatprep.mubr.f32.mxu1 %v3948_v41  ;;  %v253_v34 = vmul.f32 1.442695, %v222_v47  ;;  %v3685_v46 = vrot.slane %v609_v53, %v3348_v32  ;;  %v587_v23 = vcombine.high %v2933_v22, %v2933_v22  ;;  %3093 = vpow2.f32 %v251_v45  ;;  %v3952_v53 = vld [vmem:[#allocation8_spill] sm:$0xff] }
  0xdb   :  { %v1670_v26 = vsub.f32 %v3674_v56, %v3359_v43  ;;  %v769_v13 = vmul.f32 %v3661_v1, %v711_v48  ;;  %v764_v11 = vmul.f32 %v3625_v35, %v703_v19  ;;  %v220_v12 = vmul.f32 -3.125, %v204_v55  ;;  %v2936_v48 = vld.sshfl [vmem:[%s3915_s1 + $0x1c] sm:$0x33 pattern:$0x75316420] }
  0xdc   :  { %v247_v28 = vmul.f32 1.442695, %v219_v40  ;;  %v1865_v36 = vmul.f32 -1.125, %v3326_v62  ;;  %v1895_v17 = vmul.f32 1.442695, %v1872_v33  ;;  %3095 = vpow2.f32 %v1885_v25 }
  0xdd   :  { %2957 = vmatmul.mubr.msk.f32.vlgmr.msra.gmra.mxu1 %vm780_vm0, %v768_v16  ;;  %2953 = vmatmul.mubr.msk.f32.vlgmr.msra.gmra.mxu0 %vm780_vm0, %v764_v11  ;;  %v1870_v30 = vmul.f32 -1.125, %v3422_v57  ;;  %v3700_v31 = vrot.slane %v587_v23, %v3348_v32  ;;  %3097 = vpow2.f32 %v253_v34  ;;  %v1686_v60 = vmul.f32 %v1670_v26, %v1670_v26 }
  0xde   :  { %1368 = vmatprep.mubr.f32.mxu1 %v3948_v41  ;;  %v3080_v51 = vpop.eup %3079  ;;  %1267 = vmatprep.mubr.f32.mxu0 %v3948_v41  ;;  %v1671_v62 = vsub.f32 %v3691_v59, %v3359_v43  ;;  %v715_v15 = vrot.slane %v3685_v46, %v3284_v24  ;;  %3099 = vpow2.f32 %v247_v28  ;;  %v249_v57 = vmul.f32 1.442695, %v220_v12  ;;  %v3953_v12 = vld [vmem:[#allocation6_spill] sm:$0xff] }
  0xdf   :  { %1530 = vmatprep.subr.mxu1 %v3080_v51  ;;  %v1668_v14 = vsub.f32 %v3674_v56, %v3356_v42  ;;  %v1881_v21 = vmul.f32 1.442695, %v1865_v36  ;;  %3101 = vpow2.f32 %v1895_v17  ;;  %v1891_v54 = vmul.f32 1.442695, %v1870_v30 }
  0xe0   :  { %v3082_v10 = vpop.eup %3081  ;;  %v707_v43 = vrot.slane %v3700_v31, %v3284_v24  ;;  %v1702_v22 = vmul.f32 -1.125, %v1686_v60  ;;  %v1687_v0 = vmul.f32 %v1671_v62, %v1671_v62  ;;  %v770_v61 = vmul.f32 %v3641_v63, %v715_v15  ;;  %v2935_v63 = vld.sshfl [vmem:[%s3915_s1 + $0x18] sm:$0x33 pattern:$0x75316420]  ;;  %v3954_v62 = vld [vmem:[#allocation9_spill] sm:$0xff] }
  0xe1   :  { %2958 = vmatmul.mubr.msk.f32.gmra.mxu1 %vm780_vm0, %v769_v13  ;;  %v3084_v37 = vpop.eup %3083  ;;  %v3715_v38 = vrot.slane %v2936_v48, %v3348_v32  ;;  %3103 = vpow2.f32 %v249_v57  ;;  %v1684_v6 = vmul.f32 %v1668_v14, %v1668_v14  ;;  %v1669_v20 = vsub.f32 %v3691_v59, %v3356_v42  ;;  %s3188_s1 = smov [#allocation2]  }
  0xe2   :  { %1374 = vmatprep.mubr.f32.mxu1 %v3948_v41  ;;  %v3086_v5 = vpop.eup %3085  ;;  %1531 = vmatpush1.msra.mxu1 %v3082_v10  ;;  %3105 = vpow2.f32 %v1881_v21  ;;  %v1871_v45 = vmul.f32 -1.125, %v3952_v53  ;;  %v653_v16 = vcombine.high %v2936_v48, %v2936_v48  ;;  %v1720_v55 = vmul.f32 1.442695, %v1702_v22  ;;  %v3955_v48 = vld [vmem:[#allocation5_spill] sm:$0xff]  ;;  %s2918_s30 = sshll.u32 %s3188_s1, 4  ;;  %s2919_s30 = int_to_ptr.vmem [resolvable:$true] %s2918_s30 }
  0xe3   :  { %v3088_v9 = vpop.eup %3087  ;;  %2184 = vmatprep.subr.mxu1 %v3084_v37  ;;  %3107 = vpow2.f32 %v1891_v54  ;;  %v1703_v40 = vmul.f32 -1.125, %v1687_v0  ;;  %v771_v42 = vmul.f32 %v3661_v1, %v715_v15  ;;  %v1700_v25 = vmul.f32 -1.125, %v1684_v6  ;;  %s3161_s5 = scalar_lea.vmem %s2919_s30, 16384  ;;  %p3166_p1 = scmp.lt.s32.totalorder %s2919_s30, %s2919_s30 }
  0xe4   :  { %v3090_v3 = vpop.eup %3089  ;;  %1429 = vmatprep.subr.mxu0 %v3088_v9  ;;  %v1685_v34 = vmul.f32 %v1669_v20, %v1669_v20  ;;  %v766_v23 = vmul.f32 %v3625_v35, %v707_v43  ;;  %v3732_v51 = vrot.slane %v2935_v63, %v3348_v32  ;;  %v1876_v26 = vmul.f32 -1.125, %v3487_v44  ;;  %v3956_v20 = vld [vmem:[#allocation10_spill] sm:$0xff]  ;;  %p3162_p0 = scmp.ne.s32.totalorder %s2919_s30, %s3161_s5  ;;  %p3167_p2 = scmp.lt.s32.totalorder %s3161_s5, %s3161_s5 }
  0xe5   :  { %v3092_v8 = vpop.eup %3091  ;;  %1430 = vmatpush1.msra.mxu0 %v3086_v5  ;;  %v765_v47 = vmul.f32 %v3090_v3, %v703_v19  ;;  %2959 = vmatmul.mubr.msk.f32.gmra.mxu1 %vm780_vm0, %v770_v61  ;;  %v727_v19 = vrot.slane %v3715_v38, %v3284_v24  ;;  %v1893_v13 = vmul.f32 1.442695, %v1871_v45  ;;  %v3739_v1 = vrot.slane %v653_v16, %v3348_v32 }
  0xe6   :  { %2083 = vmatprep.subr.mxu0 %v3092_v8  ;;  %1380 = vmatprep.mubr.f32.mxu1 %v3948_v41  ;;  %v631_v11 = vcombine.high %v2935_v63, %v2935_v63  ;;  %v1674_v35 = vsub.f32 %v3674_v56, %v3953_v12  ;;  %3109 = vpow2.f32 %v1720_v55  ;;  %v1722_v28 = vmul.f32 1.442695, %v1703_v40  ;;  %p3168_p3 = por %p3167_p2, %p3166_p1 }
  0xe7   :  { %2954 = vmatmul.mubr.msk.f32.gmra.mxu0 %vm780_vm0, %v765_v47  ;;  %v3094_v33 = vpop.eup %3093  ;;  %v1716_v17 = vmul.f32 1.442695, %v1700_v25  ;;  %v1701_v37 = vmul.f32 -1.125, %v1685_v34  ;;  %v767_v30 = vmul.f32 %v3090_v3, %v707_v43  ;;  %v719_v5 = vrot.slane %v3732_v51, %v3284_v24 }
  0xe8   :  { %1273 = vmatprep.mubr.f32.mxu0 %v3948_v41  ;;  %v776_v44 = vmul.f32 %v3094_v33, %v727_v19  ;;  %v1869_v15 = vmul.f32 -1.125, %v3954_v62  ;;  %v1903_v9 = vmul.f32 1.442695, %v1876_v26  ;;  %3111 = vpow2.f32 %v1893_v13  ;;  %v3958_v62 = vld [vmem:[#allocation12_spill] sm:$0xff]  ;;  %p3169_p4 = pnand %p3168_p3, %p3162_p0 }
  0xe9   :  { %2960 = vmatmul.mubr.msk.f32.gmra.mxu1 %vm780_vm0, %v771_v42  ;;  %v3096_v10 = vpop.eup %3095  ;;  %v1874_v14 = vmul.f32 -1.125, %v3499_v4  ;;  %v731_v21 = vrot.slane %v3739_v1, %v3284_v24  ;;  %v3753_v3 = vrot.slane %v631_v11, %v3348_v32  ;;  %v1690_v8 = vmul.f32 %v1674_v35, %v1674_v35 }
  0xea   :  { %1564 = vmatprep.mubr.f32.mxu1 %v3948_v41  ;;  %v3098_v36 = vpop.eup %3097  ;;  %v1675_v54 = vsub.f32 %v3691_v59, %v3953_v12  ;;  %3113 = vpow2.f32 %v1722_v28  ;;  %v1672_v4 = vsub.f32 %v3674_v56, %v3955_v48  ;;  %v1718_v22 = vmul.f32 1.442695, %v1701_v37 }
  0xeb   :  { %2955 = vmatmul.mubr.msk.f32.gmra.mxu0 %vm780_vm0, %v766_v23  ;;  %v3100_v60 = vpop.eup %3099  ;;  %v777_v43 = vmul.f32 %v3098_v36, %v727_v19  ;;  %3115 = vpow2.f32 %v1716_v17  ;;  %v1889_v32 = vmul.f32 1.442695, %v1869_v15  ;;  %v1915_v47 = vcombine.high %v3956_v20, %v3956_v20 }
  0xec   :  { %1279 = vmatprep.mubr.f32.mxu0 %v3948_v41  ;;  %v3102_v57 = vpop.eup %3101  ;;  %v772_v0 = vmul.f32 %v3100_v60, %v719_v5  ;;  %3117 = vpow2.f32 %v1903_v9  ;;  %v1899_v53 = vmul.f32 1.442695, %v1874_v14  ;;  %v1706_v63 = vmul.f32 -1.125, %v1690_v8  ;;  %v3959_v8 = vld [vmem:[#allocation14_spill] sm:$0xff] }
  0xed   :  { %2965 = vmatmul.mubr.msk.f32.vlgmr.msra.gmra.mxu1 %vm780_vm0, %v776_v44  ;;  %v1691_v16 = vmul.f32 %v1675_v54, %v1675_v54  ;;  %v778_v55 = vmul.f32 %v3094_v33, %v731_v21  ;;  %v723_v40 = vrot.slane %v3753_v3, %v3284_v24  ;;  %v1688_v42 = vmul.f32 %v1672_v4, %v1672_v4 }
  0xee   :  { %2185 = vmatpush1.msra.mxu1 %v3096_v10  ;;  %1570 = vmatprep.mubr.f32.mxu1 %v3948_v41  ;;  %v3104_v61 = vpop.eup %3103  ;;  %v1673_v19 = vsub.f32 %v3691_v59, %v3955_v48  ;;  %3119 = vpow2.f32 %v1718_v22  ;;  %v1875_v34 = vmul.f32 -1.125, %v3485_v52  ;;  %v1940_v33 = vrot.slane %v1915_v47, %v3284_v24  ;;  %v3957_v10 = vld [vmem:[#allocation7_spill] sm:$0xff]  ;;  %v3960_v22 = vld [vmem:[#allocation13_spill] sm:$0xff] }
  0xef   :  { %2956 = vmatmul.mubr.msk.f32.gmra.mxu0 %vm780_vm0, %v767_v30  ;;  %2386 = vmatprep.subr.mxu1 %v3102_v57  ;;  %v3106_v6 = vpop.eup %3105  ;;  %v773_v25 = vmul.f32 %v3104_v61, %v719_v5  ;;  %3121 = vpow2.f32 %v1889_v32  ;;  %v1728_v23 = vmul.f32 1.442695, %v1706_v63  ;;  %v1707_v26 = vmul.f32 -1.125, %v1691_v16 }
  0xf0   :  { %1463 = vmatprep.mubr.f32.mxu0 %v3948_v41  ;;  %v3108_v45 = vpop.eup %3107  ;;  %3123 = vpow2.f32 %v1899_v53  ;;  %v779_v13 = vmul.f32 %v3098_v36, %v731_v21  ;;  %v1913_v12 = vcombine.high %v3957_v10, %v3957_v10  ;;  %v1704_v35 = vmul.f32 -1.125, %v1688_v42  ;;  %v3961_v53 = vld [vmem:[#allocation11_spill] sm:$0xff] }
  0xf1   :  { %2966 = vmatmul.mubr.msk.f32.gmra.mxu1 %vm780_vm0, %v777_v43  ;;  %v1689_v28 = vmul.f32 %v1673_v19, %v1673_v19  ;;  %v774_v44 = vmul.f32 %v3100_v60, %v723_v40  ;;  %v1880_v52 = vmul.f32 -1.125, %v3622_v58  ;;  %v1901_v17 = vmul.f32 1.442695, %v1875_v34 }
  0xf2   :  { %1576 = vmatprep.mubr.f32.mxu1 %v3948_v41  ;;  %v1678_v37 = vsub.f32 %v3674_v56, %v3449_v18  ;;  %3125 = vpow2.f32 %v1728_v23  ;;  %v1730_v30 = vmul.f32 1.442695, %v1707_v26  ;;  %v1916_v60 = vcombine.high %v3958_v62, %v3958_v62 }
  0xf3   :  { %2961 = vmatmul.mubr.msk.f32.vlgmr.msra.gmra.mxu0 %vm780_vm0, %v772_v0  ;;  %v3110_v11 = vpop.eup %3109  ;;  %v1932_v15 = vrot.slane %v1913_v12, %v3284_v24  ;;  %v1724_v9 = vmul.f32 1.442695, %v1704_v35  ;;  %v1705_v57 = vmul.f32 -1.125, %v1689_v28  ;;  %v775_v14 = vmul.f32 %v3104_v61, %v723_v40 }
  0xf4   :  { %2084 = vmatpush1.msra.mxu0 %v3106_v6  ;;  %1469 = vmatprep.mubr.f32.mxu0 %v3948_v41  ;;  %v2013_v5 = vmul.f32 %v3110_v11, %v1940_v33  ;;  %v1873_v54 = vmul.f32 -1.125, %v3959_v8  ;;  %v1911_v43 = vmul.f32 1.442695, %v1880_v52  ;;  %3127 = vpow2.f32 %v1901_v17 }
  0xf5   :  { %2285 = vmatprep.subr.mxu0 %v3108_v45  ;;  %2967 = vmatmul.mubr.msk.f32.gmra.mxu1 %vm780_vm0, %v778_v55  ;;  %v3112_v36 = vpop.eup %3111  ;;  %v1878_v4 = vmul.f32 -1.125, %v3635_v49  ;;  %v1676_v0 = vsub.f32 %v3674_v56, %v3960_v22  ;;  %v1694_v32 = vmul.f32 %v1678_v37, %v1678_v37  ;;  %v1679_v61 = vsub.f32 %v3691_v59, %v3449_v18 }
  0xf6   :  { %1582 = vmatprep.mubr.f32.mxu1 %v3948_v41  ;;  %3129 = vpow2.f32 %v1730_v30  ;;  %v1944_v20 = vrot.slane %v1916_v60, %v3284_v24  ;;  %v1726_v47 = vmul.f32 1.442695, %v1705_v57  ;;  %v1914_v45 = vcombine.high %v3961_v53, %v3961_v53  ;;  %v3963_v30 = vld [vmem:[#allocation16_spill] sm:$0xff] }
  0xf7   :  { %2962 = vmatmul.mubr.msk.f32.gmra.mxu0 %vm780_vm0, %v773_v25  ;;  %v3114_v58 = vpop.eup %3113  ;;  %3131 = vpow2.f32 %v1724_v9  ;;  %v1897_v16 = vmul.f32 1.442695, %v1873_v54  ;;  %v1907_v55 = vmul.f32 1.442695, %v1878_v4  ;;  %v1692_v40 = vmul.f32 %v1676_v0, %v1676_v0  ;;  %v3964_v9 = vld [vmem:[#allocation17_spill] sm:$0xff] }
  0xf8   :  { %1475 = vmatprep.mubr.f32.mxu0 %v3948_v41  ;;  %v3116_v21 = vpop.eup %3115  ;;  %v2014_v6 = vmul.f32 %v3114_v58, %v1940_v33  ;;  %3133 = vpow2.f32 %v1911_v43  ;;  %v1710_v19 = vmul.f32 -1.125, %v1694_v32  ;;  %v1695_v25 = vmul.f32 %v1679_v61, %v1679_v61  ;;  %v3962_v33 = vld [vmem:[#allocation15_spill] sm:$0xff] }
  0xf9   :  { %2968 = vmatmul.mubr.msk.f32.gmra.mxu1 %vm780_vm0, %v779_v13  ;;  %v3118_v48 = vpop.eup %3117  ;;  %v2009_v49 = vmul.f32 %v3116_v21, %v1932_v15  ;;  %v2015_v34 = vmul.f32 %v3110_v11, %v1944_v20  ;;  %v1919_v23 = vcombine.high %v3962_v33, %v3962_v33  ;;  %v1677_v26 = vsub.f32 %v3691_v59, %v3960_v22 }
  0xfa   :  { %2218 = vmatprep.mubr.f32.mxu1 %v3948_v41  ;;  %3135 = vpow2.f32 %v1726_v47  ;;  %v1936_v10 = vrot.slane %v1914_v45, %v3284_v24  ;;  %v1879_v12 = vmul.f32 -1.125, %v3616_v39  ;;  %v1736_v11 = vmul.f32 1.442695, %v1710_v19 }
  0xfb   :  { %2963 = vmatmul.mubr.msk.f32.gmra.mxu0 %vm780_vm0, %v774_v44  ;;  %v3120_v63 = vpop.eup %3119  ;;  %3137 = vpow2.f32 %v1897_v16  ;;  %v1711_v35 = vmul.f32 -1.125, %v1695_v25  ;;  %v2016_v28 = vmul.f32 %v3114_v58, %v1944_v20  ;;  %v1956_v44 = vrot.slane %v1919_v23, %v3284_v24 }
  0xfc   :  { %1481 = vmatprep.mubr.f32.mxu0 %v3948_v41  ;;  %v3122_v18 = vpop.eup %3121  ;;  %v2010_v13 = vmul.f32 %v3120_v63, %v1932_v15  ;;  %3139 = vpow2.f32 %v1907_v55  ;;  %v1708_v17 = vmul.f32 -1.125, %v1692_v40  ;;  %v1693_v37 = vmul.f32 %v1677_v26, %v1677_v26 }
  0xfd   :  { %2976 = vmatmul.mubr.msk.f32.vlgmr.msra.gmra.mxu1 %vm780_vm0, %v2013_v5  ;;  %v3124_v42 = vpop.eup %3123  ;;  %v1917_v5 = vcombine.high %v3963_v30, %v3963_v30  ;;  %v1909_v39 = vmul.f32 1.442695, %v1879_v12  ;;  %v1682_v62 = vsub.f32 %v3674_v56, %v3569_v27  ;;  %3141 = vpow2.f32 %v1736_v11 }
  0xfe   :  { %2387 = vmatpush1.msra.mxu1 %v3112_v36  ;;  %2224 = vmatprep.mubr.f32.mxu1 %v3948_v41  ;;  %v2011_v36 = vmul.f32 %v3116_v21, %v1936_v10  ;;  %v1738_v58 = vmul.f32 1.442695, %v1711_v35  ;;  %v1920_v57 = vcombine.high %v3964_v9, %v3964_v9  ;;  %v1732_v21 = vmul.f32 1.442695, %v1708_v17 }
  0xff   :  { %2964 = vmatmul.mubr.msk.f32.gmra.mxu0 %vm780_vm0, %v775_v14  ;;  %2588 = vmatprep.subr.mxu1 %v3118_v48  ;;  %v3126_v52 = vpop.eup %3125  ;;  %v1709_v8 = vmul.f32 -1.125, %v1693_v37  ;;  %v2012_v54 = vmul.f32 %v3120_v63, %v1936_v10  ;;  %v1948_v43 = vrot.slane %v1917_v5, %v3284_v24  ;;  %v1877_v4 = vmul.f32 -1.125, %v3633_v7 }
 0x100   :  { %2117 = vmatprep.mubr.f32.mxu0 %v3948_v41  ;;  %v2021_v15 = vmul.f32 %v3126_v52, %v1956_v44  ;;  %3143 = vpow2.f32 %v1909_v39  ;;  %v1680_v0 = vsub.f32 %v3674_v56, %v3576_v50  ;;  %v1698_v32 = vmul.f32 %v1682_v62, %v1682_v62  ;;  %v3965_v56 = vld [vmem:[#allocation18_spill] sm:$0xff] }
 0x101   :  { %2977 = vmatmul.mubr.msk.f32.gmra.mxu1 %vm780_vm0, %v2014_v6  ;;  %v3128_v60 = vpop.eup %3127  ;;  %v1683_v61 = vsub.f32 %v3691_v59, %v3569_v27  ;;  %3145 = vpow2.f32 %v1738_v58  ;;  %v1960_v7 = vrot.slane %v1920_v57, %v3284_v24  ;;  %v1734_v20 = vmul.f32 1.442695, %v1709_v8 }
 0x102   :  { %2230 = vmatprep.mubr.f32.mxu1 %v3948_v41  ;;  %3147 = vpow2.f32 %v1732_v21  ;;  %v1905_v45 = vmul.f32 1.442695, %v1877_v4  ;;  %v1696_v63 = vmul.f32 %v1680_v0, %v1680_v0  ;;  %v1681_v19 = vsub.f32 %v3691_v59, %v3576_v50 }
 0x103   :  { %2972 = vmatmul.mubr.msk.f32.vlgmr.msra.gmra.mxu0 %vm780_vm0, %v2009_v49  ;;  %v3130_v14 = vpop.eup %3129  ;;  %v1918_v49 = vcombine.high %v3965_v56, %v3965_v56  ;;  %v1699_v55 = vmul.f32 %v1683_v61, %v1683_v61  ;;  %v2023_v40 = vmul.f32 %v3126_v52, %v1960_v7  ;;  %3149 = vpow2.f32 %v1734_v20 }
 0x104   :  { %2286 = vmatpush1.msra.mxu0 %v3122_v18  ;;  %2123 = vmatprep.mubr.f32.mxu0 %v3948_v41  ;;  %v3132_v48 = vpop.eup %3131  ;;  %v2022_v6 = vmul.f32 %v3130_v14, %v1956_v44  ;;  %v1714_v18 = vmul.f32 -1.125, %v1698_v32  ;;  %3151 = vpow2.f32 %v1905_v45  ;;  %v1712_v59 = vmul.f32 -1.125, %v1696_v63 }
 0x105   :  { %2487 = vmatprep.subr.mxu0 %v3124_v42  ;;  %2978 = vmatmul.mubr.msk.f32.gmra.mxu1 %vm780_vm0, %v2015_v34  ;;  %v3134_v22 = vpop.eup %3133  ;;  %v2017_v47 = vmul.f32 %v3132_v48, %v1948_v43  ;;  %v1923_v42 = vcombine.high %v3559_v29, %v3559_v29  ;;  %v1952_v34 = vrot.slane %v1918_v49, %v3284_v24  ;;  %v1715_v23 = vmul.f32 -1.125, %v1699_v55 }
 0x106   :  { %2236 = vmatprep.mubr.f32.mxu1 %v3948_v41  ;;  %v1744_v33 = vmul.f32 1.442695, %v1714_v18  ;;  %v2024_v29 = vmul.f32 %v3130_v14, %v1960_v7  ;;  %v1921_v12 = vcombine.high %v3667_v2, %v3667_v2  ;;  %v1924_v44 = vcombine.high %v3685_v46, %v3685_v46 }
 0x107   :  { %2973 = vmatmul.mubr.msk.f32.gmra.mxu0 %vm780_vm0, %v2010_v13  ;;  %v3136_v53 = vpop.eup %3135  ;;  %v1972_v26 = vrot.slane %v1923_v42, %v3284_v24  ;;  %v1697_v13 = vmul.f32 %v1681_v19, %v1681_v19  ;;  %v2019_v10 = vmul.f32 %v3132_v48, %v1952_v34  ;;  %v1746_v35 = vmul.f32 1.442695, %v1715_v23 }
 0x108   :  { %2129 = vmatprep.mubr.f32.mxu0 %v3948_v41  ;;  %v3138_v27 = vpop.eup %3137  ;;  %v2018_v25 = vmul.f32 %v3136_v53, %v1948_v43  ;;  %3153 = vpow2.f32 %v1744_v33  ;;  %v1740_v17 = vmul.f32 1.442695, %v1712_v59  ;;  %v1964_v2 = vrot.slane %v1921_v12, %v3284_v24 }
 0x109   :  { %2979 = vmatmul.mubr.msk.f32.gmra.mxu1 %vm780_vm0, %v2016_v28  ;;  %v3140_v16 = vpop.eup %3139  ;;  %v1713_v37 = vmul.f32 -1.125, %v1697_v13  ;;  %3155 = vpow2.f32 %v1746_v35  ;;  %v1976_v46 = vrot.slane %v1924_v44, %v3284_v24  ;;  %v1927_v57 = vcombine.high %v3715_v38, %v3715_v38 }
 0x10a   :  { %2420 = vmatprep.mubr.f32.mxu1 %v3948_v41  ;;  %v3142_v50 = vpop.eup %3141  ;;  %3157 = vpow2.f32 %v1740_v17  ;;  %v1925_v38 = vcombine.high %v3732_v51, %v3732_v51  ;;  %v1928_v4 = vcombine.high %v3739_v1, %v3739_v1  ;;  %v1926_v1 = vcombine.high %v3753_v3, %v3753_v3 }
 0x10b   :  { %2974 = vmatmul.mubr.msk.f32.gmra.mxu0 %vm780_vm0, %v2011_v36  ;;  %v2029_v28 = vmul.f32 %v3142_v50, %v1972_v26  ;;  %v2020_v36 = vmul.f32 %v3136_v53, %v1952_v34  ;;  %v1742_v39 = vmul.f32 1.442695, %v1713_v37  ;;  %v2031_v9 = vmul.f32 %v3142_v50, %v1976_v46 }
 0x10c   :  { %2135 = vmatprep.mubr.f32.mxu0 %v3948_v41  ;;  %v1988_v8 = vrot.slane %v1927_v57, %v3284_v24  ;;  %v1980_v32 = vrot.slane %v1925_v38, %v3284_v24  ;;  %v1984_v49 = vrot.slane %v1926_v1, %v3284_v24 }
 0x10d   :  { %2984 = vmatmul.mubr.msk.f32.vlgmr.msra.gmra.mxu1 %vm780_vm0, %v2021_v15  ;;  %v3144_v11 = vpop.eup %3143  ;;  %3159 = vpow2.f32 %v1742_v39 }
 0x10e   :  { %2589 = vmatpush1.msra.mxu1 %v3128_v60  ;;  %2426 = vmatprep.mubr.f32.mxu1 %v3948_v41  ;;  %v3146_v52 = vpop.eup %3145  ;;  %v1922_v60 = vcombine.high %v3700_v31, %v3700_v31 }
 0x10f   :  { %2975 = vmatmul.mubr.msk.f32.gmra.mxu0 %vm780_vm0, %v2012_v54  ;;  %2790 = vmatprep.subr.mxu1 %v3134_v22  ;;  %v3148_v30 = vpop.eup %3147  ;;  %v2030_v5 = vmul.f32 %v3146_v52, %v1972_v26  ;;  %v2032_v31 = vmul.f32 %v3146_v52, %v1976_v46 }
 0x110   :  { %2319 = vmatprep.mubr.f32.mxu0 %v3948_v41  ;;  %v2025_v62 = vmul.f32 %v3148_v30, %v1964_v2  ;;  %v3150_v58 = vpop.eup %3149  ;;  %v1968_v21 = vrot.slane %v1922_v60, %v3284_v24 }
 0x111   :  { %2985 = vmatmul.mubr.msk.f32.gmra.mxu1 %vm780_vm0, %v2022_v6  ;;  %v3152_v15 = vpop.eup %3151  ;;  %v2026_v14 = vmul.f32 %v3150_v58, %v1964_v2  ;;  %v1992_v6 = vrot.slane %v1928_v4, %v3284_v24 }
 0x112   :  { %2432 = vmatprep.mubr.f32.mxu1 %v3948_v41  ;;  %v2027_v43 = vmul.f32 %v3148_v30, %v1968_v21  ;;  %v2028_v0 = vmul.f32 %v3150_v58, %v1968_v21 }
 0x113   :  { %2980 = vmatmul.mubr.msk.f32.vlgmr.msra.gmra.mxu0 %vm780_vm0, %v2017_v47 }
 0x114   :  { %2488 = vmatpush1.msra.mxu0 %v3138_v27  ;;  %2325 = vmatprep.mubr.f32.mxu0 %v3948_v41 }
 0x115   :  { %2689 = vmatprep.subr.mxu0 %v3140_v16  ;;  %2986 = vmatmul.mubr.msk.f32.gmra.mxu1 %vm780_vm0, %v2023_v40  ;;  %v3154_v54 = vpop.eup %3153 }
 0x116   :  { %2438 = vmatprep.mubr.f32.mxu1 %v3948_v41  ;;  %v2037_v48 = vmul.f32 %v3154_v54, %v1988_v8  ;;  %v3156_v22 = vpop.eup %3155  ;;  %v2039_v47 = vmul.f32 %v3154_v54, %v1992_v6 }
 0x117   :  { %2981 = vmatmul.mubr.msk.f32.gmra.mxu0 %vm780_vm0, %v2018_v25  ;;  %v3158_v61 = vpop.eup %3157  ;;  %v2038_v51 = vmul.f32 %v3156_v22, %v1988_v8  ;;  %v2040_v3 = vmul.f32 %v3156_v22, %v1992_v6 }
 0x118   :  { %2331 = vmatprep.mubr.f32.mxu0 %v3948_v41  ;;  %v2033_v7 = vmul.f32 %v3158_v61, %v1980_v32  ;;  %v2035_v53 = vmul.f32 %v3158_v61, %v1984_v49 }
 0x119   :  { %2987 = vmatmul.mubr.msk.f32.gmra.mxu1 %vm780_vm0, %v2024_v29 }
 0x11a   :  { %2622 = vmatprep.mubr.f32.mxu1 %v3948_v41  ;;  %v3160_v20 = vpop.eup %3159 }
 0x11b   :  { %2982 = vmatmul.mubr.msk.f32.gmra.mxu0 %vm780_vm0, %v2019_v10  ;;  %v2034_v56 = vmul.f32 %v3160_v20, %v1980_v32  ;;  %v2036_v45 = vmul.f32 %v3160_v20, %v1984_v49 }
 0x11c   :  { %2337 = vmatprep.mubr.f32.mxu0 %v3948_v41 }
 0x11d   :  { %2992 = vmatmul.mubr.msk.f32.vlgmr.msra.gmra.mxu1 %vm780_vm0, %v2029_v28 }
 0x11e   :  { %2791 = vmatpush1.msra.mxu1 %v3144_v11  ;;  %2628 = vmatprep.mubr.f32.mxu1 %v3948_v41 }
 0x11f   :  { %2983 = vmatmul.mubr.msk.f32.gmra.mxu0 %vm780_vm0, %v2020_v36 }
 0x120   :  { %2521 = vmatprep.mubr.f32.mxu0 %v3948_v41 }
 0x121   :  { %2993 = vmatmul.mubr.msk.f32.gmra.mxu1 %vm780_vm0, %v2030_v5 }
 0x122   :  { %2634 = vmatprep.mubr.f32.mxu1 %v3948_v41 }
 0x123   :  { %2988 = vmatmul.mubr.msk.f32.vlgmr.msra.gmra.mxu0 %vm780_vm0, %v2025_v62 }
 0x124   :  { %2690 = vmatpush1.msra.mxu0 %v3152_v15  ;;  %2527 = vmatprep.mubr.f32.mxu0 %v3948_v41 }
 0x125   :  { %2994 = vmatmul.mubr.msk.f32.gmra.mxu1 %vm780_vm0, %v2031_v9 }
 0x126   :  { %2640 = vmatprep.mubr.f32.mxu1 %v3948_v41 }
 0x127   :  { %2989 = vmatmul.mubr.msk.f32.gmra.mxu0 %vm780_vm0, %v2026_v14 }
 0x128   :  { %2533 = vmatprep.mubr.f32.mxu0 %v3948_v41 }
 0x129   :  { %2995 = vmatmul.mubr.msk.f32.gmra.mxu1 %vm780_vm0, %v2032_v31 }
 0x12a   :  { %2824 = vmatprep.mubr.f32.mxu1 %v3948_v41 }
 0x12b   :  { %2990 = vmatmul.mubr.msk.f32.gmra.mxu0 %vm780_vm0, %v2027_v43 }
 0x12c   :  { %2539 = vmatprep.mubr.f32.mxu0 %v3948_v41 }
 0x12d   :  { %3000 = vmatmul.mubr.msk.f32.vlgmr.msra.gmra.mxu1 %vm780_vm0, %v2037_v48 }
 0x12e   :  { %2830 = vmatprep.mubr.f32.mxu1 %v3948_v41 }
 0x12f   :  { %2991 = vmatmul.mubr.msk.f32.gmra.mxu0 %vm780_vm0, %v2028_v0 }
 0x130   :  { %2723 = vmatprep.mubr.f32.mxu0 %v3948_v41 }
 0x131   :  { %3001 = vmatmul.mubr.msk.f32.gmra.mxu1 %vm780_vm0, %v2038_v51 }
 0x132   :  { %2836 = vmatprep.mubr.f32.mxu1 %v3948_v41 }
 0x133   :  { %2996 = vmatmul.mubr.msk.f32.vlgmr.msra.gmra.mxu0 %vm780_vm0, %v2033_v7 }
 0x134   :  { %2729 = vmatprep.mubr.f32.mxu0 %v3948_v41 }
 0x135   :  { %3002 = vmatmul.mubr.msk.f32.gmra.mxu1 %vm780_vm0, %v2039_v47 }
 0x136   :  { %2842 = vmatprep.mubr.f32.mxu1 %v3948_v41 }
 0x137   :  { %2997 = vmatmul.mubr.msk.f32.gmra.mxu0 %vm780_vm0, %v2034_v56 }
 0x138   :  { %2735 = vmatprep.mubr.f32.mxu0 %v3948_v41 }
 0x139   :  { %3003 = vmatmul.mubr.msk.f32.gmra.mxu1 %vm780_vm0, %v2040_v3 }
 0x13b   :  { %2998 = vmatmul.mubr.msk.f32.gmra.mxu0 %vm780_vm0, %v2035_v53 }
 0x13c   :  { %2741 = vmatprep.mubr.f32.mxu0 %v3948_v41 }
 0x13f   :  { %2999 = vmatmul.mubr.msk.f32.gmra.mxu0 %vm780_vm0, %v2036_v45 }
 0x17c   :  { %v859_v24 = vpop.f32.mrf.mxu0 }
 0x17d   :  { %1589 = vst [vmem:[#allocation2] sm:$0xff] %v859_v24  ;;  %v960_v27 = vpop.f32.mrf.mxu1 }
 0x17e   :  { %1597 = vst [vmem:[#allocation2 + $0x80] sm:$0xff] %v960_v27  ;;  %v861_v63 = vpop.f32.mrf.mxu0 }
 0x17f   :  { %1590 = vst [vmem:[#allocation2 + $0x8] sm:$0xff] %v861_v63  ;;  %v962_v16 = vpop.f32.mrf.mxu1 }
 0x180   :  { %1598 = vst [vmem:[#allocation2 + $0x88] sm:$0xff] %v962_v16  ;;  %v865_v18 = vpop.f32.mrf.mxu0 }
 0x181   :  { %1591 = vst [vmem:[#allocation2 + $0x10] sm:$0xff] %v865_v18  ;;  %v966_v40 = vpop.f32.mrf.mxu1 }
 0x182   :  { %v867_v55 = vpop.f32.mrf.mxu0  ;;  %1599 = vst [vmem:[#allocation2 + $0x90] sm:$0xff] %v966_v40 }
 0x183   :  { %1592 = vst [vmem:[#allocation2 + $0x18] sm:$0xff] %v867_v55  ;;  %v968_v19 = vpop.f32.mrf.mxu1 }
 0x184   :  { %v871_v42 = vpop.f32.mrf.mxu0  ;;  %1600 = vst [vmem:[#allocation2 + $0x98] sm:$0xff] %v968_v19 }
 0x185   :  { %1593 = vst [vmem:[#allocation2 + $0x20] sm:$0xff] %v871_v42  ;;  %v972_v25 = vpop.f32.mrf.mxu1 }
 0x186   :  { %v873_v41 = vpop.f32.mrf.mxu0  ;;  %1601 = vst [vmem:[#allocation2 + $0xa0] sm:$0xff] %v972_v25 }
 0x187   :  { %1594 = vst [vmem:[#allocation2 + $0x28] sm:$0xff] %v873_v41  ;;  %v974_v33 = vpop.f32.mrf.mxu1 }
 0x188   :  { %v877_v34 = vpop.f32.mrf.mxu0  ;;  %1602 = vst [vmem:[#allocation2 + $0xa8] sm:$0xff] %v974_v33 }
 0x189   :  { %1595 = vst [vmem:[#allocation2 + $0x30] sm:$0xff] %v877_v34  ;;  %v978_v29 = vpop.f32.mrf.mxu1 }
 0x18a   :  { %v879_v23 = vpop.f32.mrf.mxu0  ;;  %1603 = vst [vmem:[#allocation2 + $0xb0] sm:$0xff] %v978_v29 }
 0x18b   :  { %1596 = vst [vmem:[#allocation2 + $0x38] sm:$0xff] %v879_v23  ;;  %v980_v50 = vpop.f32.mrf.mxu1 }
 0x18c   :  { %v1061_v26 = vpop.f32.mrf.mxu0  ;;  %1604 = vst [vmem:[#allocation2 + $0xb8] sm:$0xff] %v980_v50 }
 0x18d   :  { %1605 = vst [vmem:[#allocation2 + $0x100] sm:$0xff] %v1061_v26  ;;  %v1162_v13 = vpop.f32.mrf.mxu1 }
 0x18e   :  { %v1063_v59 = vpop.f32.mrf.mxu0  ;;  %1613 = vst [vmem:[#allocation2 + $0x180] sm:$0xff] %v1162_v13 }
 0x18f   :  { %1606 = vst [vmem:[#allocation2 + $0x108] sm:$0xff] %v1063_v59  ;;  %v1164_v12 = vpop.f32.mrf.mxu1 }
 0x190   :  { %v1067_v10 = vpop.f32.mrf.mxu0  ;;  %1614 = vst [vmem:[#allocation2 + $0x188] sm:$0xff] %v1164_v12 }
 0x191   :  { %1607 = vst [vmem:[#allocation2 + $0x110] sm:$0xff] %v1067_v10  ;;  %v1168_v35 = vpop.f32.mrf.mxu1 }
 0x192   :  { %v1069_v11 = vpop.f32.mrf.mxu0  ;;  %1615 = vst [vmem:[#allocation2 + $0x190] sm:$0xff] %v1168_v35 }
 0x193   :  { %1608 = vst [vmem:[#allocation2 + $0x118] sm:$0xff] %v1069_v11  ;;  %v1170_v44 = vpop.f32.mrf.mxu1 }
 0x194   :  { %v1073_v28 = vpop.f32.mrf.mxu0  ;;  %1616 = vst [vmem:[#allocation2 + $0x198] sm:$0xff] %v1170_v44 }
 0x195   :  { %1609 = vst [vmem:[#allocation2 + $0x120] sm:$0xff] %v1073_v28  ;;  %v1174_v17 = vpop.f32.mrf.mxu1 }
 0x196   :  { %v1075_v52 = vpop.f32.mrf.mxu0  ;;  %1617 = vst [vmem:[#allocation2 + $0x1a0] sm:$0xff] %v1174_v17 }
 0x197   :  { %1610 = vst [vmem:[#allocation2 + $0x128] sm:$0xff] %v1075_v52  ;;  %v1176_v36 = vpop.f32.mrf.mxu1 }
 0x198   :  { %v1079_v37 = vpop.f32.mrf.mxu0  ;;  %1618 = vst [vmem:[#allocation2 + $0x1a8] sm:$0xff] %v1176_v36 }
 0x199   :  { %1611 = vst [vmem:[#allocation2 + $0x130] sm:$0xff] %v1079_v37  ;;  %v1180_v30 = vpop.f32.mrf.mxu1 }
 0x19a   :  { %v1081_v2 = vpop.f32.mrf.mxu0  ;;  %1619 = vst [vmem:[#allocation2 + $0x1b0] sm:$0xff] %v1180_v30 }
 0x19b   :  { %1612 = vst [vmem:[#allocation2 + $0x138] sm:$0xff] %v1081_v2  ;;  %v1182_v5 = vpop.f32.mrf.mxu1 }
 0x19c   :  { %1620 = vst [vmem:[#allocation2 + $0x1b8] sm:$0xff] %v1182_v5 }
 0x19d   :  { %v1364_v46 = vpop.f32.mrf.mxu1  ;;  %v1263_v60 = vpop.f32.mrf.mxu0 }
 0x19e   :  { %1629 = vst [vmem:[#allocation2 + $0x280] sm:$0xff] %v1364_v46  ;;  %1621 = vst [vmem:[#allocation2 + $0x200] sm:$0xff] %v1263_v60 }
 0x19f   :  { %v1366_v39 = vpop.f32.mrf.mxu1  ;;  %v1265_v15 = vpop.f32.mrf.mxu0 }
 0x1a0   :  { %1630 = vst [vmem:[#allocation2 + $0x288] sm:$0xff] %v1366_v39  ;;  %1622 = vst [vmem:[#allocation2 + $0x208] sm:$0xff] %v1265_v15 }
 0x1a1   :  { %v1370_v62 = vpop.f32.mrf.mxu1 }
 0x1a2   :  { %1631 = vst [vmem:[#allocation2 + $0x290] sm:$0xff] %v1370_v62 }
 0x1a3   :  { %v1372_v58 = vpop.f32.mrf.mxu1 }
 0x1a4   :  { %1632 = vst [vmem:[#allocation2 + $0x298] sm:$0xff] %v1372_v58 }
 0x1a5   :  { %v1376_v9 = vpop.f32.mrf.mxu1 }
 0x1a6   :  { %1633 = vst [vmem:[#allocation2 + $0x2a0] sm:$0xff] %v1376_v9 }
 0x1a7   :  { %v1269_v57 = vpop.f32.mrf.mxu0  ;;  %v1378_v14 = vpop.f32.mrf.mxu1 }
 0x1a8   :  { %1623 = vst [vmem:[#allocation2 + $0x210] sm:$0xff] %v1269_v57  ;;  %1634 = vst [vmem:[#allocation2 + $0x2a8] sm:$0xff] %v1378_v14 }
 0x1a9   :  { %v1271_v21 = vpop.f32.mrf.mxu0  ;;  %v1382_v31 = vpop.f32.mrf.mxu1 }
 0x1aa   :  { %1624 = vst [vmem:[#allocation2 + $0x218] sm:$0xff] %v1271_v21  ;;  %1635 = vst [vmem:[#allocation2 + $0x2b0] sm:$0xff] %v1382_v31 }
 0x1ab   :  { %v1275_v8 = vpop.f32.mrf.mxu0  ;;  %v1384_v54 = vpop.f32.mrf.mxu1 }
 0x1ac   :  { %1625 = vst [vmem:[#allocation2 + $0x220] sm:$0xff] %v1275_v8  ;;  %1636 = vst [vmem:[#allocation2 + $0x2b8] sm:$0xff] %v1384_v54 }
 0x1ad   :  { %v1277_v43 = vpop.f32.mrf.mxu0  ;;  %v1566_v38 = vpop.f32.mrf.mxu1 }
 0x1ae   :  { %1626 = vst [vmem:[#allocation2 + $0x228] sm:$0xff] %v1277_v43  ;;  %1645 = vst [vmem:[#allocation2 + $0x380] sm:$0xff] %v1566_v38 }
 0x1af   :  { %v1281_v48 = vpop.f32.mrf.mxu0  ;;  %v1568_v4 = vpop.f32.mrf.mxu1 }
 0x1b0   :  { %1627 = vst [vmem:[#allocation2 + $0x230] sm:$0xff] %v1281_v48  ;;  %1646 = vst [vmem:[#allocation2 + $0x388] sm:$0xff] %v1568_v4 }
 0x1b1   :  { %v1283_v22 = vpop.f32.mrf.mxu0  ;;  %v1572_v0 = vpop.f32.mrf.mxu1 }
 0x1b2   :  { %1628 = vst [vmem:[#allocation2 + $0x238] sm:$0xff] %v1283_v22  ;;  %1647 = vst [vmem:[#allocation2 + $0x390] sm:$0xff] %v1572_v0 }
 0x1b3   :  { %v1465_v32 = vpop.f32.mrf.mxu0  ;;  %v1574_v61 = vpop.f32.mrf.mxu1 }
 0x1b4   :  { %1637 = vst [vmem:[#allocation2 + $0x300] sm:$0xff] %v1465_v32  ;;  %1648 = vst [vmem:[#allocation2 + $0x398] sm:$0xff] %v1574_v61 }
 0x1b5   :  { %v1467_v51 = vpop.f32.mrf.mxu0  ;;  %v1578_v6 = vpop.f32.mrf.mxu1 }
 0x1b6   :  { %1638 = vst [vmem:[#allocation2 + $0x308] sm:$0xff] %v1467_v51  ;;  %1649 = vst [vmem:[#allocation2 + $0x3a0] sm:$0xff] %v1578_v6 }
 0x1b7   :  { %v1471_v7 = vpop.f32.mrf.mxu0  ;;  %v1580_v1 = vpop.f32.mrf.mxu1 }
 0x1b8   :  { %1639 = vst [vmem:[#allocation2 + $0x310] sm:$0xff] %v1471_v7  ;;  %1650 = vst [vmem:[#allocation2 + $0x3a8] sm:$0xff] %v1580_v1 }
 0x1b9   :  { %v1473_v20 = vpop.f32.mrf.mxu0  ;;  %v1584_v47 = vpop.f32.mrf.mxu1 }
 0x1ba   :  { %1640 = vst [vmem:[#allocation2 + $0x318] sm:$0xff] %v1473_v20  ;;  %1651 = vst [vmem:[#allocation2 + $0x3b0] sm:$0xff] %v1584_v47 }
 0x1bb   :  { %v1477_v56 = vpop.f32.mrf.mxu0  ;;  %v1586_v49 = vpop.f32.mrf.mxu1 }
 0x1bc   :  { %1641 = vst [vmem:[#allocation2 + $0x320] sm:$0xff] %v1477_v56  ;;  %1652 = vst [vmem:[#allocation2 + $0x3b8] sm:$0xff] %v1586_v49 }
 0x1bd   :  { %v1479_v3 = vpop.f32.mrf.mxu0  ;;  %v2220_v53 = vpop.f32.mrf.mxu1 }
 0x1be   :  { %1642 = vst [vmem:[#allocation2 + $0x328] sm:$0xff] %v1479_v3  ;;  %2857 = vst [vmem:[#allocation2 + $0xc0] sm:$0xff] %v2220_v53 }
 0x1bf   :  { %v1483_v45 = vpop.f32.mrf.mxu0  ;;  %v2222_v24 = vpop.f32.mrf.mxu1 }
 0x1c0   :  { %1643 = vst [vmem:[#allocation2 + $0x330] sm:$0xff] %v1483_v45  ;;  %2858 = vst [vmem:[#allocation2 + $0xc8] sm:$0xff] %v2222_v24 }
 0x1c1   :  { %v1485_v27 = vpop.f32.mrf.mxu0  ;;  %v2226_v63 = vpop.f32.mrf.mxu1 }
 0x1c2   :  { %1644 = vst [vmem:[#allocation2 + $0x338] sm:$0xff] %v1485_v27  ;;  %2859 = vst [vmem:[#allocation2 + $0xd0] sm:$0xff] %v2226_v63 }
 0x1c3   :  { %v2119_v16 = vpop.f32.mrf.mxu0  ;;  %v2228_v18 = vpop.f32.mrf.mxu1 }
 0x1c4   :  { %2849 = vst [vmem:[#allocation2 + $0x40] sm:$0xff] %v2119_v16  ;;  %2860 = vst [vmem:[#allocation2 + $0xd8] sm:$0xff] %v2228_v18 }
 0x1c5   :  { %v2121_v55 = vpop.f32.mrf.mxu0  ;;  %v2232_v40 = vpop.f32.mrf.mxu1 }
 0x1c6   :  { %2850 = vst [vmem:[#allocation2 + $0x48] sm:$0xff] %v2121_v55  ;;  %2861 = vst [vmem:[#allocation2 + $0xe0] sm:$0xff] %v2232_v40 }
 0x1c7   :  { %v2125_v42 = vpop.f32.mrf.mxu0  ;;  %v2234_v19 = vpop.f32.mrf.mxu1 }
 0x1c8   :  { %2851 = vst [vmem:[#allocation2 + $0x50] sm:$0xff] %v2125_v42  ;;  %2862 = vst [vmem:[#allocation2 + $0xe8] sm:$0xff] %v2234_v19 }
 0x1c9   :  { %v2127_v41 = vpop.f32.mrf.mxu0  ;;  %v2238_v25 = vpop.f32.mrf.mxu1 }
 0x1ca   :  { %2852 = vst [vmem:[#allocation2 + $0x58] sm:$0xff] %v2127_v41  ;;  %2863 = vst [vmem:[#allocation2 + $0xf0] sm:$0xff] %v2238_v25 }
 0x1cb   :  { %v2131_v34 = vpop.f32.mrf.mxu0  ;;  %v2240_v33 = vpop.f32.mrf.mxu1 }
 0x1cc   :  { %2853 = vst [vmem:[#allocation2 + $0x60] sm:$0xff] %v2131_v34  ;;  %2864 = vst [vmem:[#allocation2 + $0xf8] sm:$0xff] %v2240_v33 }
 0x1cd   :  { %v2133_v23 = vpop.f32.mrf.mxu0  ;;  %v2422_v29 = vpop.f32.mrf.mxu1 }
 0x1ce   :  { %2854 = vst [vmem:[#allocation2 + $0x68] sm:$0xff] %v2133_v23  ;;  %2873 = vst [vmem:[#allocation2 + $0x1c0] sm:$0xff] %v2422_v29 }
 0x1cf   :  { %v2137_v26 = vpop.f32.mrf.mxu0  ;;  %v2424_v50 = vpop.f32.mrf.mxu1 }
 0x1d0   :  { %2855 = vst [vmem:[#allocation2 + $0x70] sm:$0xff] %v2137_v26  ;;  %2874 = vst [vmem:[#allocation2 + $0x1c8] sm:$0xff] %v2424_v50 }
 0x1d1   :  { %v2139_v59 = vpop.f32.mrf.mxu0  ;;  %v2428_v13 = vpop.f32.mrf.mxu1 }
 0x1d2   :  { %2856 = vst [vmem:[#allocation2 + $0x78] sm:$0xff] %v2139_v59  ;;  %2875 = vst [vmem:[#allocation2 + $0x1d0] sm:$0xff] %v2428_v13 }
 0x1d3   :  { %v2321_v10 = vpop.f32.mrf.mxu0  ;;  %v2430_v12 = vpop.f32.mrf.mxu1 }
 0x1d4   :  { %2865 = vst [vmem:[#allocation2 + $0x140] sm:$0xff] %v2321_v10  ;;  %2876 = vst [vmem:[#allocation2 + $0x1d8] sm:$0xff] %v2430_v12 }
 0x1d5   :  { %v2323_v11 = vpop.f32.mrf.mxu0  ;;  %v2434_v35 = vpop.f32.mrf.mxu1 }
 0x1d6   :  { %2866 = vst [vmem:[#allocation2 + $0x148] sm:$0xff] %v2323_v11  ;;  %2877 = vst [vmem:[#allocation2 + $0x1e0] sm:$0xff] %v2434_v35 }
 0x1d7   :  { %v2327_v28 = vpop.f32.mrf.mxu0  ;;  %v2436_v44 = vpop.f32.mrf.mxu1 }
 0x1d8   :  { %2867 = vst [vmem:[#allocation2 + $0x150] sm:$0xff] %v2327_v28  ;;  %2878 = vst [vmem:[#allocation2 + $0x1e8] sm:$0xff] %v2436_v44 }
 0x1d9   :  { %v2329_v52 = vpop.f32.mrf.mxu0  ;;  %v2440_v17 = vpop.f32.mrf.mxu1 }
 0x1da   :  { %2868 = vst [vmem:[#allocation2 + $0x158] sm:$0xff] %v2329_v52  ;;  %2879 = vst [vmem:[#allocation2 + $0x1f0] sm:$0xff] %v2440_v17 }
 0x1db   :  { %v2333_v37 = vpop.f32.mrf.mxu0  ;;  %v2442_v36 = vpop.f32.mrf.mxu1 }
 0x1dc   :  { %2869 = vst [vmem:[#allocation2 + $0x160] sm:$0xff] %v2333_v37  ;;  %2880 = vst [vmem:[#allocation2 + $0x1f8] sm:$0xff] %v2442_v36 }
 0x1dd   :  { %v2335_v2 = vpop.f32.mrf.mxu0  ;;  %v2624_v30 = vpop.f32.mrf.mxu1 }
 0x1de   :  { %2870 = vst [vmem:[#allocation2 + $0x168] sm:$0xff] %v2335_v2  ;;  %2889 = vst [vmem:[#allocation2 + $0x2c0] sm:$0xff] %v2624_v30 }
 0x1df   :  { %v2339_v5 = vpop.f32.mrf.mxu0  ;;  %v2626_v46 = vpop.f32.mrf.mxu1 }
 0x1e0   :  { %2871 = vst [vmem:[#allocation2 + $0x170] sm:$0xff] %v2339_v5  ;;  %2890 = vst [vmem:[#allocation2 + $0x2c8] sm:$0xff] %v2626_v46 }
 0x1e1   :  { %v2341_v39 = vpop.f32.mrf.mxu0  ;;  %v2630_v62 = vpop.f32.mrf.mxu1 }
 0x1e2   :  { %2872 = vst [vmem:[#allocation2 + $0x178] sm:$0xff] %v2341_v39  ;;  %2891 = vst [vmem:[#allocation2 + $0x2d0] sm:$0xff] %v2630_v62 }
 0x1e3   :  { %v2523_v60 = vpop.f32.mrf.mxu0  ;;  %v2632_v58 = vpop.f32.mrf.mxu1 }
 0x1e4   :  { %2881 = vst [vmem:[#allocation2 + $0x240] sm:$0xff] %v2523_v60  ;;  %2892 = vst [vmem:[#allocation2 + $0x2d8] sm:$0xff] %v2632_v58 }
 0x1e5   :  { %v2525_v15 = vpop.f32.mrf.mxu0  ;;  %v2636_v9 = vpop.f32.mrf.mxu1 }
 0x1e6   :  { %2882 = vst [vmem:[#allocation2 + $0x248] sm:$0xff] %v2525_v15  ;;  %2893 = vst [vmem:[#allocation2 + $0x2e0] sm:$0xff] %v2636_v9 }
 0x1e7   :  { %v2529_v57 = vpop.f32.mrf.mxu0  ;;  %v2638_v14 = vpop.f32.mrf.mxu1 }
 0x1e8   :  { %2883 = vst [vmem:[#allocation2 + $0x250] sm:$0xff] %v2529_v57  ;;  %2894 = vst [vmem:[#allocation2 + $0x2e8] sm:$0xff] %v2638_v14 }
 0x1e9   :  { %v2531_v21 = vpop.f32.mrf.mxu0  ;;  %v2642_v31 = vpop.f32.mrf.mxu1 }
 0x1ea   :  { %2884 = vst [vmem:[#allocation2 + $0x258] sm:$0xff] %v2531_v21  ;;  %2895 = vst [vmem:[#allocation2 + $0x2f0] sm:$0xff] %v2642_v31 }
 0x1eb   :  { %v2535_v8 = vpop.f32.mrf.mxu0  ;;  %v2644_v54 = vpop.f32.mrf.mxu1 }
 0x1ec   :  { %2885 = vst [vmem:[#allocation2 + $0x260] sm:$0xff] %v2535_v8  ;;  %2896 = vst [vmem:[#allocation2 + $0x2f8] sm:$0xff] %v2644_v54 }
 0x1ed   :  { %v2537_v43 = vpop.f32.mrf.mxu0  ;;  %v2826_v38 = vpop.f32.mrf.mxu1 }
 0x1ee   :  { %2886 = vst [vmem:[#allocation2 + $0x268] sm:$0xff] %v2537_v43  ;;  %2905 = vst [vmem:[#allocation2 + $0x3c0] sm:$0xff] %v2826_v38 }
 0x1ef   :  { %v2541_v48 = vpop.f32.mrf.mxu0  ;;  %v2828_v4 = vpop.f32.mrf.mxu1 }
 0x1f0   :  { %2887 = vst [vmem:[#allocation2 + $0x270] sm:$0xff] %v2541_v48  ;;  %2906 = vst [vmem:[#allocation2 + $0x3c8] sm:$0xff] %v2828_v4 }
 0x1f1   :  { %v2543_v22 = vpop.f32.mrf.mxu0  ;;  %v2832_v0 = vpop.f32.mrf.mxu1 }
 0x1f2   :  { %2888 = vst [vmem:[#allocation2 + $0x278] sm:$0xff] %v2543_v22  ;;  %2907 = vst [vmem:[#allocation2 + $0x3d0] sm:$0xff] %v2832_v0 }
 0x1f3   :  { %v2725_v32 = vpop.f32.mrf.mxu0  ;;  %v2834_v61 = vpop.f32.mrf.mxu1 }
 0x1f4   :  { %2897 = vst [vmem:[#allocation2 + $0x340] sm:$0xff] %v2725_v32  ;;  %2908 = vst [vmem:[#allocation2 + $0x3d8] sm:$0xff] %v2834_v61 }
 0x1f5   :  { %v2727_v51 = vpop.f32.mrf.mxu0  ;;  %v2838_v6 = vpop.f32.mrf.mxu1 }
 0x1f6   :  { %2898 = vst [vmem:[#allocation2 + $0x348] sm:$0xff] %v2727_v51  ;;  %2909 = vst [vmem:[#allocation2 + $0x3e0] sm:$0xff] %v2838_v6 }
 0x1f7   :  { %v2731_v7 = vpop.f32.mrf.mxu0  ;;  %v2840_v1 = vpop.f32.mrf.mxu1 }
 0x1f8   :  { %2899 = vst [vmem:[#allocation2 + $0x350] sm:$0xff] %v2731_v7  ;;  %2910 = vst [vmem:[#allocation2 + $0x3e8] sm:$0xff] %v2840_v1 }
 0x1f9   :  { %v2733_v20 = vpop.f32.mrf.mxu0  ;;  %v2844_v47 = vpop.f32.mrf.mxu1 }
 0x1fa   :  { %2900 = vst [vmem:[#allocation2 + $0x358] sm:$0xff] %v2733_v20  ;;  %2911 = vst [vmem:[#allocation2 + $0x3f0] sm:$0xff] %v2844_v47 }
 0x1fb   :  { %v2737_v56 = vpop.f32.mrf.mxu0  ;;  %v2846_v49 = vpop.f32.mrf.mxu1 }
 0x1fc   :  { %2901 = vst [vmem:[#allocation2 + $0x360] sm:$0xff] %v2737_v56  ;;  %2912 = vst [vmem:[#allocation2 + $0x3f8] sm:$0xff] %v2846_v49 }
 0x1fd   :  { %v2739_v3 = vpop.f32.mrf.mxu0 }
 0x1fe   :  { %2902 = vst [vmem:[#allocation2 + $0x368] sm:$0xff] %v2739_v3 }
 0x1ff   :  { %v2743_v53 = vpop.f32.mrf.mxu0 }
 0x200   :  { %2903 = vst [vmem:[#allocation2 + $0x370] sm:$0xff] %v2743_v53 }
 0x201   :  { %v2745_v45 = vpop.f32.mrf.mxu0 }
 0x202   :  { %2904 = vst [vmem:[#allocation2 + $0x378] sm:$0xff] %v2745_v45 }
 0x203   :  { %3172 = shalt.err (!%p3169_p4)
}
 0x204   :  { %s3189_s6 = smov 256   ;;  %s3190_s7 = smov 16  }
 0x205   :  { %2924 = dma.vmem_to_hbm [thread:$0]  %s2919_s30, 16384, %s3918_s4, [#allocation3], %s3189_s6, %s3189_s6, %s3190_s7  }
 0x206   :  { %3181 = dma.done.wait [#allocation3], 16384  }
 0x207   :  { %3182 = vsyncadd [#allocation3], 4294950912 }
 0x208   :  { %2928 = vsyncpa [#allocation3], 1 }

</bundles_post_ra>
